<compile_context>
chip_gen: v6e
topology: v6e:2x2x1
jax: 0.10.0
libtpu: 0.0.40
codegen_flags: <defaults>
</compile_context>

<pallas_src>
import jax
import jax.numpy as jnp
from jax import lax
from jax.experimental import pallas as pl
from jax.experimental.pallas import tpu as pltpu


def _make_align_conv_kernel(H, W, K, Cin, Cout, Tp):
    KK = K * K

    def kernel(x_ref, pos_ref, w_ref, o_ref):
        # x_ref:   (1, Cin*H, W)
        # pos_ref: (1, 2*KK, Tp)
        # w_ref:   (Cout, KK*Cin)
        # o_ref:   (1, Cout, Tp)
        x = x_ref[0]                                           # (Cin*H, W)
        pos = pos_ref[0]                                       # (2*KK, Tp)
        h_iota = lax.broadcasted_iota(jnp.int32, (H, Tp), 0)
        w_iota = lax.broadcasted_iota(jnp.int32, (W, Tp), 0)

        samples = []
        for k in range(KK):                                    # 9 taps, tiny temps
            py = pos[k:k + 1, :]                               # (1, Tp)
            px = pos[KK + k:KK + k + 1, :]                     # (1, Tp)
            y0f = jnp.floor(py)
            x0f = jnp.floor(px)
            ly = py - y0f
            lx = px - x0f
            # Clamp before the int cast; rows/cols outside [0, H-1]/[0, W-1] never
            # match the iota, which reproduces deform-conv's validity/zero-padding
            # semantics exactly (out-of-range sample points contribute 0).
            y0 = jnp.clip(y0f, -2.0, float(H)).astype(jnp.int32)
            x0 = jnp.clip(x0f, -2.0, float(W)).astype(jnp.int32)

            row_w = (jnp.where(h_iota == y0, 1.0 - ly, 0.0) +
                     jnp.where(h_iota == y0 + 1, ly, 0.0))     # (H, Tp)
            col_w = (jnp.where(w_iota == x0, 1.0 - lx, 0.0) +
                     jnp.where(w_iota == x0 + 1, lx, 0.0))     # (W, Tp)

            # Separable bilinear sampling (column pass on the MXU):
            #   b[c*H + h, p] = sum_w x[c*H + h, w] * col_w[w, p]
            b = lax.dot_general(x, col_w, (((1,), (0,)), ((), ())),
                                preferred_element_type=jnp.float32)   # (Cin*H, Tp)
            # Row pass: cheap elementwise multiply + reduce over H.
            s = jnp.sum(b.reshape(Cin, H, Tp) * row_w[None, :, :], axis=1)  # (Cin, Tp)
            samples.append(s)

        # One fused conv contraction of depth KK*Cin (instead of 9 depth-Cin dots).
        S = jnp.concatenate(samples, axis=0)                   # (KK*Cin, Tp)
        out = lax.dot_general(w_ref[...], S, (((1,), (0,)), ((), ())),
                              preferred_element_type=jnp.float32)     # (Cout, Tp)
        o_ref[0] = jnp.maximum(out, 0.0).astype(o_ref.dtype)   # ReLU

    return kernel


def _get_offset_single(anchors, featmap_size, stride, kernel_size):
    # Faithful port of AlignConv.get_offset for a single image; anchors: (HW, 5).
    feat_h, feat_w = featmap_size
    dtype = anchors.dtype
    pad = (kernel_size - 1) // 2
    idx = jnp.arange(-pad, pad + 1, dtype=dtype)
    yy, xx = jnp.meshgrid(idx, idx, indexing="ij")   # torch.meshgrid default = 'ij'
    xx = xx.reshape(-1)
    yy = yy.reshape(-1)
    xc = jnp.arange(0, feat_w, dtype=dtype)
    yc = jnp.arange(0, feat_h, dtype=dtype)
    yc, xc = jnp.meshgrid(yc, xc, indexing="ij")
    xc = xc.reshape(-1)
    yc = yc.reshape(-1)
    x_conv = xc[:, None] + xx            # (HW, KK) conv base grid
    y_conv = yc[:, None] + yy
    x_ctr, y_ctr, w, h, a = [anchors[:, i] for i in range(5)]
    x_ctr, y_ctr, w, h = x_ctr / stride, y_ctr / stride, w / stride, h / stride
    cos, sin = jnp.cos(a), jnp.sin(a)
    dw, dh = w / kernel_size, h / kernel_size
    x = dw[:, None] * xx
    y = dh[:, None] * yy
    xr = cos[:, None] * x - sin[:, None] * y
    yr = sin[:, None] * x + cos[:, None] * y
    x_anchor = xr + x_ctr[:, None]
    y_anchor = yr + y_ctr[:, None]
    offset_x = x_anchor - x_conv
    offset_y = y_anchor - y_conv
    return offset_y, offset_x, y_conv, x_conv


def _pick_pixel_tile(HW):
    # Largest lane-dense tile that divides HW and still gives >=2 grid points.
    tp = HW
    for cand in (512, 256, 128):
        if HW % cand == 0:
            tp = cand
            if HW // cand >= 2:
                break
    return tp


def align_conv_forward(x_nchw, anchors, stride, weight):
    """x_nchw: (N, Cin, H, W); anchors: (N, H*W, 5); weight: (Cout, Cin, K, K)."""
    N, Cin, H, W = x_nchw.shape
    Cout, _, K, _ = weight.shape
    KK, HW = K * K, H * W

    off_y, off_x, y_conv, x_conv = jax.vmap(
        lambda a: _get_offset_single(a, (H, W), stride, K))(anchors)
    # Absolute deform-conv sampling positions = base conv grid + offsets.
    pos_y = jnp.transpose(y_conv + off_y, (0, 2, 1))   # (N, KK, HW)
    pos_x = jnp.transpose(x_conv + off_x, (0, 2, 1))
    pos = jnp.concatenate([pos_y, pos_x], axis=1)      # (N, 2*KK, HW) single input

    # Channels-on-sublane layouts (free reshapes; no transposes of the features).
    x_mat = x_nchw.reshape(N, Cin * H, W)                            # row = c*H + h
    w2 = jnp.transpose(weight, (0, 2, 3, 1)).reshape(Cout, KK * Cin)  # col = k*Cin+c

    Tp = _pick_pixel_tile(HW)
    # TODO(synk): for very large Cin*H (big detection backbones) the whole-image
    # x block should additionally be tiled over channels / rows to fit v7x's
    # 64 MiB VMEM with double-buffering.
    kernel = _make_align_conv_kernel(H, W, K, Cin, Cout, Tp)
    out = pl.pallas_call(
        kernel,
        out_shape=jax.ShapeDtypeStruct((N, Cout, HW), jnp.float32),
        grid_spec=pltpu.PrefetchScalarGridSpec(
            num_scalar_prefetch=0,
            grid=(N, HW // Tp),
            in_specs=[
                # whole image features per batch element (reused across pixel tiles)
                pl.BlockSpec((1, Cin * H, W), lambda b, t: (b, 0, 0)),
                # per-tile absolute sampling coordinates
                pl.BlockSpec((1, 2 * KK, Tp), lambda b, t: (b, 0, t)),
                # conv weight, constant across the grid (stays resident)
                pl.BlockSpec((Cout, KK * Cin), lambda b, t: (0, 0)),
            ],
            out_specs=pl.BlockSpec((1, Cout, Tp), lambda b, t: (b, 0, t)),
        ),
        compiler_params=pltpu.CompilerParams(
            dimension_semantics=("parallel", "parallel"),
            # Explicit, conservative scoped-VMEM budget (safe on v5e/v6e/v7x);
            # re-derive if Tp or Cin*H is scaled up.
            vmem_limit_bytes=32 * 1024 * 1024,
        ),
    )(x_mat, pos, w2)

    return out.reshape(N, Cout, H, W)                  # already NCHW (free reshape)


def _reference_forward(x_nchw, anchors, stride, weight):
    # Pure-JAX reference (explicit bilinear gather) for correctness check.
    N, Cin, H, W = x_nchw.shape
    Cout, _, K, _ = weight.shape
    KK, HW = K * K, H * W
    off_y, off_x, y_conv, x_conv = jax.vmap(
        lambda a: _get_offset_single(a, (H, W), stride, K))(anchors)
    pos_y = y_conv + off_y
    pos_x = x_conv + off_x
    x_feat = jnp.transpose(x_nchw, (0, 2, 3, 1)).reshape(N, HW, Cin)
    w_taps = jnp.transpose(weight, (2, 3, 1, 0)).reshape(KK, Cin, Cout)
    outs = []
    for b in range(N):
        acc = jnp.zeros((HW, Cout), jnp.float32)
        for k in range(KK):
            py, px = pos_y[b, :, k], pos_x[b, :, k]
            valid = (py > -1) & (px > -1) & (py < H) & (px < W)
            y0, x0 = jnp.floor(py), jnp.floor(px)
            ly, lx = py - y0, px - x0
            samp = jnp.zeros((HW, Cin), jnp.float32)
            for dy, dx, wy, wx in ((0, 0, 1 - ly, 1 - lx), (0, 1, 1 - ly, lx),
                                   (1, 0, ly, 1 - lx), (1, 1, ly, lx)):
                yy, xx = y0 + dy, x0 + dx
                inb = (yy >= 0) & (yy <= H - 1) & (xx >= 0) & (xx <= W - 1)
                idx = jnp.clip(yy * W + xx, 0, HW - 1).astype(jnp.int32)
                wgt = jnp.where(valid & inb, wy * wx, 0.0)[:, None]
                samp = samp + wgt * x_feat[b][idx]
            acc = acc + samp @ w_taps[k]
        outs.append(jnp.maximum(acc, 0.0))
    return jnp.stack(outs).reshape(N, H, W, Cout).transpose(0, 3, 1, 2)


if __name__ == "__main__":
    N, Cin, Cout, H, W, K = 2, 4, 8, 16, 16, 3
    stride = 8.0
    key = jax.random.PRNGKey(0)
    k1, k2, k3, k4 = jax.random.split(key, 4)

    x = jax.random.normal(k1, (N, Cin, H, W), jnp.float32)

    # Rotated anchors (x_ctr, y_ctr, w, h, angle), one per feature location.
    xs = (jnp.arange(W, dtype=jnp.float32) + 0.5) * stride
    ys = (jnp.arange(H, dtype=jnp.float32) + 0.5) * stride
    yc, xc = jnp.meshgrid(ys, xs, indexing="ij")
    ctr = jnp.stack([xc.reshape(-1), yc.reshape(-1)], axis=-1)          # (HW, 2)
    ctr = jnp.broadcast_to(ctr, (N, H * W, 2))
    wh = stride * (2.0 + 4.0 * jax.random.uniform(k2, (N, H * W, 2), jnp.float32))
    ang = (jax.random.uniform(k3, (N, H * W, 1), jnp.float32) - 0.5) * jnp.pi
    anchors = jnp.concatenate([ctr, wh, ang], axis=-1)                  # (N, HW, 5)

    # DeformConv weight (Cout, Cin, K, K), no bias; deterministic synthetic init.
    weight = 0.05 * jax.random.normal(k4, (Cout, Cin, K, K), jnp.float32)

    fwd = jax.jit(align_conv_forward)
    out = fwd(x, anchors, stride, weight)
    out = jax.block_until_ready(out)

    ref = _reference_forward(x, anchors, stride, weight)
    assert out.shape == (N, Cout, H, W)
    assert jnp.allclose(out, ref, rtol=1e-4, atol=1e-4), (
        float(jnp.max(jnp.abs(out - ref))))
    print("KERNEL_OK")
</pallas_src>

<mosaic_0001>
module attributes {stable_mosaic.version = 11 : i64} {
  func.func @kernel(%arg0: i32, %arg1: i32, %arg2: memref<1x64x16xf32, #tpu.memory_space<vmem>>, %arg3: memref<1x18x128xf32, #tpu.memory_space<vmem>>, %arg4: memref<8x36xf32, #tpu.memory_space<vmem>>, %arg5: memref<1x8x128xf32, #tpu.memory_space<vmem>>) attributes {dimension_semantics = [#tpu.dimension_semantics<parallel>, #tpu.dimension_semantics<parallel>], iteration_bounds = array<i64: 2, 2>, scalar_prefetch = 0 : i64, scratch_operands = 0 : i64, tpu.core_type = #tpu.core_type<tc>, window_params = [{transform_indices = @transform_0, window_bounds = array<i64: 1, 64, 16>}, {transform_indices = @transform_1, window_bounds = array<i64: 1, 18, 128>}, {pipeline_mode = #tpu.pipeline_mode<synchronous>, transform_indices = @transform_2, window_bounds = array<i64: 8, 36>}, {transform_indices = @transform_3, window_bounds = array<i64: 1, 8, 128>}]} {
    %c0 = arith.constant 0 : index
    %c0_0 = arith.constant 0 : index
    %c0_1 = arith.constant 0 : index
    %0 = vector.load %arg2[%c0, %c0_0, %c0_1] : memref<1x64x16xf32, #tpu.memory_space<vmem>>, vector<1x64x16xf32>
    %1 = vector.shape_cast %0 : vector<1x64x16xf32> to vector<64x16xf32>
    %c0_2 = arith.constant 0 : index
    %c0_3 = arith.constant 0 : index
    %c0_4 = arith.constant 0 : index
    %2 = vector.load %arg3[%c0_2, %c0_3, %c0_4] : memref<1x18x128xf32, #tpu.memory_space<vmem>>, vector<1x18x128xf32>
    %3 = vector.shape_cast %2 : vector<1x18x128xf32> to vector<18x128xf32>
    %4 = tpu.iota {dimensions = array<i32: 0>} : vector<16x128xi32>
    %5 = tpu.iota {dimensions = array<i32: 0>} : vector<16x128xi32>
    %6 = vector.extract_strided_slice %3 {offsets = [0, 0], sizes = [1, 128], strides = [1, 1]} : vector<18x128xf32> to vector<1x128xf32>
    %7 = vector.extract_strided_slice %3 {offsets = [9, 0], sizes = [1, 128], strides = [1, 1]} : vector<18x128xf32> to vector<1x128xf32>
    %8 = math.floor %6 : vector<1x128xf32>
    %9 = math.floor %7 : vector<1x128xf32>
    %10 = arith.subf %6, %8 : vector<1x128xf32>
    %11 = arith.subf %7, %9 : vector<1x128xf32>
    %cst = arith.constant -2.000000e+00 : f32
    %cst_5 = arith.constant 1.600000e+01 : f32
    %12 = vector.broadcast %cst : f32 to vector<1x128xf32>
    %13 = arith.maximumf %12, %8 : vector<1x128xf32>
    %14 = vector.broadcast %cst_5 : f32 to vector<1x128xf32>
    %15 = arith.minimumf %14, %13 : vector<1x128xf32>
    %16 = arith.fptosi %15 : vector<1x128xf32> to vector<1x128xi32>
    %cst_6 = arith.constant -2.000000e+00 : f32
    %cst_7 = arith.constant 1.600000e+01 : f32
    %17 = vector.broadcast %cst_6 : f32 to vector<1x128xf32>
    %18 = arith.maximumf %17, %9 : vector<1x128xf32>
    %19 = vector.broadcast %cst_7 : f32 to vector<1x128xf32>
    %20 = arith.minimumf %19, %18 : vector<1x128xf32>
    %21 = arith.fptosi %20 : vector<1x128xf32> to vector<1x128xi32>
    %22 = vector.broadcast %16 : vector<1x128xi32> to vector<16x128xi32>
    %23 = arith.cmpi eq, %4, %22 : vector<16x128xi32>
    %cst_8 = arith.constant 1.000000e+00 : f32
    %24 = vector.broadcast %cst_8 : f32 to vector<1x128xf32>
    %25 = arith.subf %24, %10 : vector<1x128xf32>
    %cst_9 = arith.constant 0.000000e+00 : f32
    %26 = vector.shape_cast %25 : vector<1x128xf32> to vector<1x128xf32>
    %27 = vector.broadcast %26 : vector<1x128xf32> to vector<16x128xf32>
    %28 = vector.broadcast %cst_9 : f32 to vector<16x128xf32>
    %29 = arith.select %23, %27, %28 : vector<16x128xi1>, vector<16x128xf32>
    %c1_i32 = arith.constant 1 : i32
    %30 = vector.broadcast %c1_i32 : i32 to vector<1x128xi32>
    %31 = arith.addi %16, %30 : vector<1x128xi32>
    %32 = vector.broadcast %31 : vector<1x128xi32> to vector<16x128xi32>
    %33 = arith.cmpi eq, %4, %32 : vector<16x128xi32>
    %cst_10 = arith.constant 0.000000e+00 : f32
    %34 = vector.shape_cast %10 : vector<1x128xf32> to vector<1x128xf32>
    %35 = vector.broadcast %34 : vector<1x128xf32> to vector<16x128xf32>
    %36 = vector.broadcast %cst_10 : f32 to vector<16x128xf32>
    %37 = arith.select %33, %35, %36 : vector<16x128xi1>, vector<16x128xf32>
    %38 = arith.addf %29, %37 : vector<16x128xf32>
    %39 = vector.broadcast %21 : vector<1x128xi32> to vector<16x128xi32>
    %40 = arith.cmpi eq, %5, %39 : vector<16x128xi32>
    %cst_11 = arith.constant 1.000000e+00 : f32
    %41 = vector.broadcast %cst_11 : f32 to vector<1x128xf32>
    %42 = arith.subf %41, %11 : vector<1x128xf32>
    %cst_12 = arith.constant 0.000000e+00 : f32
    %43 = vector.shape_cast %42 : vector<1x128xf32> to vector<1x128xf32>
    %44 = vector.broadcast %43 : vector<1x128xf32> to vector<16x128xf32>
    %45 = vector.broadcast %cst_12 : f32 to vector<16x128xf32>
    %46 = arith.select %40, %44, %45 : vector<16x128xi1>, vector<16x128xf32>
    %c1_i32_13 = arith.constant 1 : i32
    %47 = vector.broadcast %c1_i32_13 : i32 to vector<1x128xi32>
    %48 = arith.addi %21, %47 : vector<1x128xi32>
    %49 = vector.broadcast %48 : vector<1x128xi32> to vector<16x128xi32>
    %50 = arith.cmpi eq, %5, %49 : vector<16x128xi32>
    %cst_14 = arith.constant 0.000000e+00 : f32
    %51 = vector.shape_cast %11 : vector<1x128xf32> to vector<1x128xf32>
    %52 = vector.broadcast %51 : vector<1x128xf32> to vector<16x128xf32>
    %53 = vector.broadcast %cst_14 : f32 to vector<16x128xf32>
    %54 = arith.select %50, %52, %53 : vector<16x128xi1>, vector<16x128xf32>
    %55 = arith.addf %46, %54 : vector<16x128xf32>
    %cst_15 = arith.constant dense<0.000000e+00> : vector<64x128xf32>
    %56 = tpu.matmul %1, %55, %cst_15 {dimension_numbers = #tpu.dot_dimension_numbers<[1], [0], [0], [1], [0, 0, 1, 1], [], []>} : vector<64x16xf32>, vector<16x128xf32>, vector<64x128xf32> -> vector<64x128xf32>
    %57 = vector.shape_cast %56 : vector<64x128xf32> to vector<4x16x128xf32>
    %58 = vector.shape_cast %38 : vector<16x128xf32> to vector<1x16x128xf32>
    %59 = vector.broadcast %58 : vector<1x16x128xf32> to vector<4x16x128xf32>
    %60 = arith.mulf %57, %59 : vector<4x16x128xf32>
    %cst_16 = arith.constant dense<0.000000e+00> : vector<4x128xf32>
    %61 = vector.multi_reduction <add>, %60, %cst_16 [1] : vector<4x16x128xf32> to vector<4x128xf32>
    %62 = vector.extract_strided_slice %3 {offsets = [1, 0], sizes = [1, 128], strides = [1, 1]} : vector<18x128xf32> to vector<1x128xf32>
    %63 = vector.extract_strided_slice %3 {offsets = [10, 0], sizes = [1, 128], strides = [1, 1]} : vector<18x128xf32> to vector<1x128xf32>
    %64 = math.floor %62 : vector<1x128xf32>
    %65 = math.floor %63 : vector<1x128xf32>
    %66 = arith.subf %62, %64 : vector<1x128xf32>
    %67 = arith.subf %63, %65 : vector<1x128xf32>
    %cst_17 = arith.constant -2.000000e+00 : f32
    %cst_18 = arith.constant 1.600000e+01 : f32
    %68 = vector.broadcast %cst_17 : f32 to vector<1x128xf32>
    %69 = arith.maximumf %68, %64 : vector<1x128xf32>
    %70 = vector.broadcast %cst_18 : f32 to vector<1x128xf32>
    %71 = arith.minimumf %70, %69 : vector<1x128xf32>
    %72 = arith.fptosi %71 : vector<1x128xf32> to vector<1x128xi32>
    %cst_19 = arith.constant -2.000000e+00 : f32
    %cst_20 = arith.constant 1.600000e+01 : f32
    %73 = vector.broadcast %cst_19 : f32 to vector<1x128xf32>
    %74 = arith.maximumf %73, %65 : vector<1x128xf32>
    %75 = vector.broadcast %cst_20 : f32 to vector<1x128xf32>
    %76 = arith.minimumf %75, %74 : vector<1x128xf32>
    %77 = arith.fptosi %76 : vector<1x128xf32> to vector<1x128xi32>
    %78 = vector.broadcast %72 : vector<1x128xi32> to vector<16x128xi32>
    %79 = arith.cmpi eq, %4, %78 : vector<16x128xi32>
    %cst_21 = arith.constant 1.000000e+00 : f32
    %80 = vector.broadcast %cst_21 : f32 to vector<1x128xf32>
    %81 = arith.subf %80, %66 : vector<1x128xf32>
    %cst_22 = arith.constant 0.000000e+00 : f32
    %82 = vector.shape_cast %81 : vector<1x128xf32> to vector<1x128xf32>
    %83 = vector.broadcast %82 : vector<1x128xf32> to vector<16x128xf32>
    %84 = vector.broadcast %cst_22 : f32 to vector<16x128xf32>
    %85 = arith.select %79, %83, %84 : vector<16x128xi1>, vector<16x128xf32>
    %c1_i32_23 = arith.constant 1 : i32
    %86 = vector.broadcast %c1_i32_23 : i32 to vector<1x128xi32>
    %87 = arith.addi %72, %86 : vector<1x128xi32>
    %88 = vector.broadcast %87 : vector<1x128xi32> to vector<16x128xi32>
    %89 = arith.cmpi eq, %4, %88 : vector<16x128xi32>
    %cst_24 = arith.constant 0.000000e+00 : f32
    %90 = vector.shape_cast %66 : vector<1x128xf32> to vector<1x128xf32>
    %91 = vector.broadcast %90 : vector<1x128xf32> to vector<16x128xf32>
    %92 = vector.broadcast %cst_24 : f32 to vector<16x128xf32>
    %93 = arith.select %89, %91, %92 : vector<16x128xi1>, vector<16x128xf32>
    %94 = arith.addf %85, %93 : vector<16x128xf32>
    %95 = vector.broadcast %77 : vector<1x128xi32> to vector<16x128xi32>
    %96 = arith.cmpi eq, %5, %95 : vector<16x128xi32>
    %cst_25 = arith.constant 1.000000e+00 : f32
    %97 = vector.broadcast %cst_25 : f32 to vector<1x128xf32>
    %98 = arith.subf %97, %67 : vector<1x128xf32>
    %cst_26 = arith.constant 0.000000e+00 : f32
    %99 = vector.shape_cast %98 : vector<1x128xf32> to vector<1x128xf32>
    %100 = vector.broadcast %99 : vector<1x128xf32> to vector<16x128xf32>
    %101 = vector.broadcast %cst_26 : f32 to vector<16x128xf32>
    %102 = arith.select %96, %100, %101 : vector<16x128xi1>, vector<16x128xf32>
    %c1_i32_27 = arith.constant 1 : i32
    %103 = vector.broadcast %c1_i32_27 : i32 to vector<1x128xi32>
    %104 = arith.addi %77, %103 : vector<1x128xi32>
    %105 = vector.broadcast %104 : vector<1x128xi32> to vector<16x128xi32>
    %106 = arith.cmpi eq, %5, %105 : vector<16x128xi32>
    %cst_28 = arith.constant 0.000000e+00 : f32
    %107 = vector.shape_cast %67 : vector<1x128xf32> to vector<1x128xf32>
    %108 = vector.broadcast %107 : vector<1x128xf32> to vector<16x128xf32>
    %109 = vector.broadcast %cst_28 : f32 to vector<16x128xf32>
    %110 = arith.select %106, %108, %109 : vector<16x128xi1>, vector<16x128xf32>
    %111 = arith.addf %102, %110 : vector<16x128xf32>
    %cst_29 = arith.constant dense<0.000000e+00> : vector<64x128xf32>
    %112 = tpu.matmul %1, %111, %cst_29 {dimension_numbers = #tpu.dot_dimension_numbers<[1], [0], [0], [1], [0, 0, 1, 1], [], []>} : vector<64x16xf32>, vector<16x128xf32>, vector<64x128xf32> -> vector<64x128xf32>
    %113 = vector.shape_cast %112 : vector<64x128xf32> to vector<4x16x128xf32>
    %114 = vector.shape_cast %94 : vector<16x128xf32> to vector<1x16x128xf32>
    %115 = vector.broadcast %114 : vector<1x16x128xf32> to vector<4x16x128xf32>
    %116 = arith.mulf %113, %115 : vector<4x16x128xf32>
    %cst_30 = arith.constant dense<0.000000e+00> : vector<4x128xf32>
    %117 = vector.multi_reduction <add>, %116, %cst_30 [1] : vector<4x16x128xf32> to vector<4x128xf32>
    %118 = vector.extract_strided_slice %3 {offsets = [2, 0], sizes = [1, 128], strides = [1, 1]} : vector<18x128xf32> to vector<1x128xf32>
    %119 = vector.extract_strided_slice %3 {offsets = [11, 0], sizes = [1, 128], strides = [1, 1]} : vector<18x128xf32> to vector<1x128xf32>
    %120 = math.floor %118 : vector<1x128xf32>
    %121 = math.floor %119 : vector<1x128xf32>
    %122 = arith.subf %118, %120 : vector<1x128xf32>
    %123 = arith.subf %119, %121 : vector<1x128xf32>
    %cst_31 = arith.constant -2.000000e+00 : f32
    %cst_32 = arith.constant 1.600000e+01 : f32
    %124 = vector.broadcast %cst_31 : f32 to vector<1x128xf32>
    %125 = arith.maximumf %124, %120 : vector<1x128xf32>
    %126 = vector.broadcast %cst_32 : f32 to vector<1x128xf32>
    %127 = arith.minimumf %126, %125 : vector<1x128xf32>
    %128 = arith.fptosi %127 : vector<1x128xf32> to vector<1x128xi32>
    %cst_33 = arith.constant -2.000000e+00 : f32
    %cst_34 = arith.constant 1.600000e+01 : f32
    %129 = vector.broadcast %cst_33 : f32 to vector<1x128xf32>
    %130 = arith.maximumf %129, %121 : vector<1x128xf32>
    %131 = vector.broadcast %cst_34 : f32 to vector<1x128xf32>
    %132 = arith.minimumf %131, %130 : vector<1x128xf32>
    %133 = arith.fptosi %132 : vector<1x128xf32> to vector<1x128xi32>
    %134 = vector.broadcast %128 : vector<1x128xi32> to vector<16x128xi32>
    %135 = arith.cmpi eq, %4, %134 : vector<16x128xi32>
    %cst_35 = arith.constant 1.000000e+00 : f32
    %136 = vector.broadcast %cst_35 : f32 to vector<1x128xf32>
    %137 = arith.subf %136, %122 : vector<1x128xf32>
    %cst_36 = arith.constant 0.000000e+00 : f32
    %138 = vector.shape_cast %137 : vector<1x128xf32> to vector<1x128xf32>
    %139 = vector.broadcast %138 : vector<1x128xf32> to vector<16x128xf32>
    %140 = vector.broadcast %cst_36 : f32 to vector<16x128xf32>
    %141 = arith.select %135, %139, %140 : vector<16x128xi1>, vector<16x128xf32>
    %c1_i32_37 = arith.constant 1 : i32
    %142 = vector.broadcast %c1_i32_37 : i32 to vector<1x128xi32>
    %143 = arith.addi %128, %142 : vector<1x128xi32>
    %144 = vector.broadcast %143 : vector<1x128xi32> to vector<16x128xi32>
    %145 = arith.cmpi eq, %4, %144 : vector<16x128xi32>
    %cst_38 = arith.constant 0.000000e+00 : f32
    %146 = vector.shape_cast %122 : vector<1x128xf32> to vector<1x128xf32>
    %147 = vector.broadcast %146 : vector<1x128xf32> to vector<16x128xf32>
    %148 = vector.broadcast %cst_38 : f32 to vector<16x128xf32>
    %149 = arith.select %145, %147, %148 : vector<16x128xi1>, vector<16x128xf32>
    %150 = arith.addf %141, %149 : vector<16x128xf32>
    %151 = vector.broadcast %133 : vector<1x128xi32> to vector<16x128xi32>
    %152 = arith.cmpi eq, %5, %151 : vector<16x128xi32>
    %cst_39 = arith.constant 1.000000e+00 : f32
    %153 = vector.broadcast %cst_39 : f32 to vector<1x128xf32>
    %154 = arith.subf %153, %123 : vector<1x128xf32>
    %cst_40 = arith.constant 0.000000e+00 : f32
    %155 = vector.shape_cast %154 : vector<1x128xf32> to vector<1x128xf32>
    %156 = vector.broadcast %155 : vector<1x128xf32> to vector<16x128xf32>
    %157 = vector.broadcast %cst_40 : f32 to vector<16x128xf32>
    %158 = arith.select %152, %156, %157 : vector<16x128xi1>, vector<16x128xf32>
    %c1_i32_41 = arith.constant 1 : i32
    %159 = vector.broadcast %c1_i32_41 : i32 to vector<1x128xi32>
    %160 = arith.addi %133, %159 : vector<1x128xi32>
    %161 = vector.broadcast %160 : vector<1x128xi32> to vector<16x128xi32>
    %162 = arith.cmpi eq, %5, %161 : vector<16x128xi32>
    %cst_42 = arith.constant 0.000000e+00 : f32
    %163 = vector.shape_cast %123 : vector<1x128xf32> to vector<1x128xf32>
    %164 = vector.broadcast %163 : vector<1x128xf32> to vector<16x128xf32>
    %165 = vector.broadcast %cst_42 : f32 to vector<16x128xf32>
    %166 = arith.select %162, %164, %165 : vector<16x128xi1>, vector<16x128xf32>
    %167 = arith.addf %158, %166 : vector<16x128xf32>
    %cst_43 = arith.constant dense<0.000000e+00> : vector<64x128xf32>
    %168 = tpu.matmul %1, %167, %cst_43 {dimension_numbers = #tpu.dot_dimension_numbers<[1], [0], [0], [1], [0, 0, 1, 1], [], []>} : vector<64x16xf32>, vector<16x128xf32>, vector<64x128xf32> -> vector<64x128xf32>
    %169 = vector.shape_cast %168 : vector<64x128xf32> to vector<4x16x128xf32>
    %170 = vector.shape_cast %150 : vector<16x128xf32> to vector<1x16x128xf32>
    %171 = vector.broadcast %170 : vector<1x16x128xf32> to vector<4x16x128xf32>
    %172 = arith.mulf %169, %171 : vector<4x16x128xf32>
    %cst_44 = arith.constant dense<0.000000e+00> : vector<4x128xf32>
    %173 = vector.multi_reduction <add>, %172, %cst_44 [1] : vector<4x16x128xf32> to vector<4x128xf32>
    %174 = vector.extract_strided_slice %3 {offsets = [3, 0], sizes = [1, 128], strides = [1, 1]} : vector<18x128xf32> to vector<1x128xf32>
    %175 = vector.extract_strided_slice %3 {offsets = [12, 0], sizes = [1, 128], strides = [1, 1]} : vector<18x128xf32> to vector<1x128xf32>
    %176 = math.floor %174 : vector<1x128xf32>
    %177 = math.floor %175 : vector<1x128xf32>
    %178 = arith.subf %174, %176 : vector<1x128xf32>
    %179 = arith.subf %175, %177 : vector<1x128xf32>
    %cst_45 = arith.constant -2.000000e+00 : f32
    %cst_46 = arith.constant 1.600000e+01 : f32
    %180 = vector.broadcast %cst_45 : f32 to vector<1x128xf32>
    %181 = arith.maximumf %180, %176 : vector<1x128xf32>
    %182 = vector.broadcast %cst_46 : f32 to vector<1x128xf32>
    %183 = arith.minimumf %182, %181 : vector<1x128xf32>
    %184 = arith.fptosi %183 : vector<1x128xf32> to vector<1x128xi32>
    %cst_47 = arith.constant -2.000000e+00 : f32
    %cst_48 = arith.constant 1.600000e+01 : f32
    %185 = vector.broadcast %cst_47 : f32 to vector<1x128xf32>
    %186 = arith.maximumf %185, %177 : vector<1x128xf32>
    %187 = vector.broadcast %cst_48 : f32 to vector<1x128xf32>
    %188 = arith.minimumf %187, %186 : vector<1x128xf32>
    %189 = arith.fptosi %188 : vector<1x128xf32> to vector<1x128xi32>
    %190 = vector.broadcast %184 : vector<1x128xi32> to vector<16x128xi32>
    %191 = arith.cmpi eq, %4, %190 : vector<16x128xi32>
    %cst_49 = arith.constant 1.000000e+00 : f32
    %192 = vector.broadcast %cst_49 : f32 to vector<1x128xf32>
    %193 = arith.subf %192, %178 : vector<1x128xf32>
    %cst_50 = arith.constant 0.000000e+00 : f32
    %194 = vector.shape_cast %193 : vector<1x128xf32> to vector<1x128xf32>
    %195 = vector.broadcast %194 : vector<1x128xf32> to vector<16x128xf32>
    %196 = vector.broadcast %cst_50 : f32 to vector<16x128xf32>
    %197 = arith.select %191, %195, %196 : vector<16x128xi1>, vector<16x128xf32>
    %c1_i32_51 = arith.constant 1 : i32
    %198 = vector.broadcast %c1_i32_51 : i32 to vector<1x128xi32>
    %199 = arith.addi %184, %198 : vector<1x128xi32>
    %200 = vector.broadcast %199 : vector<1x128xi32> to vector<16x128xi32>
    %201 = arith.cmpi eq, %4, %200 : vector<16x128xi32>
    %cst_52 = arith.constant 0.000000e+00 : f32
    %202 = vector.shape_cast %178 : vector<1x128xf32> to vector<1x128xf32>
    %203 = vector.broadcast %202 : vector<1x128xf32> to vector<16x128xf32>
    %204 = vector.broadcast %cst_52 : f32 to vector<16x128xf32>
    %205 = arith.select %201, %203, %204 : vector<16x128xi1>, vector<16x128xf32>
    %206 = arith.addf %197, %205 : vector<16x128xf32>
    %207 = vector.broadcast %189 : vector<1x128xi32> to vector<16x128xi32>
    %208 = arith.cmpi eq, %5, %207 : vector<16x128xi32>
    %cst_53 = arith.constant 1.000000e+00 : f32
    %209 = vector.broadcast %cst_53 : f32 to vector<1x128xf32>
    %210 = arith.subf %209, %179 : vector<1x128xf32>
    %cst_54 = arith.constant 0.000000e+00 : f32
    %211 = vector.shape_cast %210 : vector<1x128xf32> to vector<1x128xf32>
    %212 = vector.broadcast %211 : vector<1x128xf32> to vector<16x128xf32>
    %213 = vector.broadcast %cst_54 : f32 to vector<16x128xf32>
    %214 = arith.select %208, %212, %213 : vector<16x128xi1>, vector<16x128xf32>
    %c1_i32_55 = arith.constant 1 : i32
    %215 = vector.broadcast %c1_i32_55 : i32 to vector<1x128xi32>
    %216 = arith.addi %189, %215 : vector<1x128xi32>
    %217 = vector.broadcast %216 : vector<1x128xi32> to vector<16x128xi32>
    %218 = arith.cmpi eq, %5, %217 : vector<16x128xi32>
    %cst_56 = arith.constant 0.000000e+00 : f32
    %219 = vector.shape_cast %179 : vector<1x128xf32> to vector<1x128xf32>
    %220 = vector.broadcast %219 : vector<1x128xf32> to vector<16x128xf32>
    %221 = vector.broadcast %cst_56 : f32 to vector<16x128xf32>
    %222 = arith.select %218, %220, %221 : vector<16x128xi1>, vector<16x128xf32>
    %223 = arith.addf %214, %222 : vector<16x128xf32>
    %cst_57 = arith.constant dense<0.000000e+00> : vector<64x128xf32>
    %224 = tpu.matmul %1, %223, %cst_57 {dimension_numbers = #tpu.dot_dimension_numbers<[1], [0], [0], [1], [0, 0, 1, 1], [], []>} : vector<64x16xf32>, vector<16x128xf32>, vector<64x128xf32> -> vector<64x128xf32>
    %225 = vector.shape_cast %224 : vector<64x128xf32> to vector<4x16x128xf32>
    %226 = vector.shape_cast %206 : vector<16x128xf32> to vector<1x16x128xf32>
    %227 = vector.broadcast %226 : vector<1x16x128xf32> to vector<4x16x128xf32>
    %228 = arith.mulf %225, %227 : vector<4x16x128xf32>
    %cst_58 = arith.constant dense<0.000000e+00> : vector<4x128xf32>
    %229 = vector.multi_reduction <add>, %228, %cst_58 [1] : vector<4x16x128xf32> to vector<4x128xf32>
    %230 = vector.extract_strided_slice %3 {offsets = [4, 0], sizes = [1, 128], strides = [1, 1]} : vector<18x128xf32> to vector<1x128xf32>
    %231 = vector.extract_strided_slice %3 {offsets = [13, 0], sizes = [1, 128], strides = [1, 1]} : vector<18x128xf32> to vector<1x128xf32>
    %232 = math.floor %230 : vector<1x128xf32>
    %233 = math.floor %231 : vector<1x128xf32>
    %234 = arith.subf %230, %232 : vector<1x128xf32>
    %235 = arith.subf %231, %233 : vector<1x128xf32>
    %cst_59 = arith.constant -2.000000e+00 : f32
    %cst_60 = arith.constant 1.600000e+01 : f32
    %236 = vector.broadcast %cst_59 : f32 to vector<1x128xf32>
    %237 = arith.maximumf %236, %232 : vector<1x128xf32>
    %238 = vector.broadcast %cst_60 : f32 to vector<1x128xf32>
    %239 = arith.minimumf %238, %237 : vector<1x128xf32>
    %240 = arith.fptosi %239 : vector<1x128xf32> to vector<1x128xi32>
    %cst_61 = arith.constant -2.000000e+00 : f32
    %cst_62 = arith.constant 1.600000e+01 : f32
    %241 = vector.broadcast %cst_61 : f32 to vector<1x128xf32>
    %242 = arith.maximumf %241, %233 : vector<1x128xf32>
    %243 = vector.broadcast %cst_62 : f32 to vector<1x128xf32>
    %244 = arith.minimumf %243, %242 : vector<1x128xf32>
    %245 = arith.fptosi %244 : vector<1x128xf32> to vector<1x128xi32>
    %246 = vector.broadcast %240 : vector<1x128xi32> to vector<16x128xi32>
    %247 = arith.cmpi eq, %4, %246 : vector<16x128xi32>
    %cst_63 = arith.constant 1.000000e+00 : f32
    %248 = vector.broadcast %cst_63 : f32 to vector<1x128xf32>
    %249 = arith.subf %248, %234 : vector<1x128xf32>
    %cst_64 = arith.constant 0.000000e+00 : f32
    %250 = vector.shape_cast %249 : vector<1x128xf32> to vector<1x128xf32>
    %251 = vector.broadcast %250 : vector<1x128xf32> to vector<16x128xf32>
    %252 = vector.broadcast %cst_64 : f32 to vector<16x128xf32>
    %253 = arith.select %247, %251, %252 : vector<16x128xi1>, vector<16x128xf32>
    %c1_i32_65 = arith.constant 1 : i32
    %254 = vector.broadcast %c1_i32_65 : i32 to vector<1x128xi32>
    %255 = arith.addi %240, %254 : vector<1x128xi32>
    %256 = vector.broadcast %255 : vector<1x128xi32> to vector<16x128xi32>
    %257 = arith.cmpi eq, %4, %256 : vector<16x128xi32>
    %cst_66 = arith.constant 0.000000e+00 : f32
    %258 = vector.shape_cast %234 : vector<1x128xf32> to vector<1x128xf32>
    %259 = vector.broadcast %258 : vector<1x128xf32> to vector<16x128xf32>
    %260 = vector.broadcast %cst_66 : f32 to vector<16x128xf32>
    %261 = arith.select %257, %259, %260 : vector<16x128xi1>, vector<16x128xf32>
    %262 = arith.addf %253, %261 : vector<16x128xf32>
    %263 = vector.broadcast %245 : vector<1x128xi32> to vector<16x128xi32>
    %264 = arith.cmpi eq, %5, %263 : vector<16x128xi32>
    %cst_67 = arith.constant 1.000000e+00 : f32
    %265 = vector.broadcast %cst_67 : f32 to vector<1x128xf32>
    %266 = arith.subf %265, %235 : vector<1x128xf32>
    %cst_68 = arith.constant 0.000000e+00 : f32
    %267 = vector.shape_cast %266 : vector<1x128xf32> to vector<1x128xf32>
    %268 = vector.broadcast %267 : vector<1x128xf32> to vector<16x128xf32>
    %269 = vector.broadcast %cst_68 : f32 to vector<16x128xf32>
    %270 = arith.select %264, %268, %269 : vector<16x128xi1>, vector<16x128xf32>
    %c1_i32_69 = arith.constant 1 : i32
    %271 = vector.broadcast %c1_i32_69 : i32 to vector<1x128xi32>
    %272 = arith.addi %245, %271 : vector<1x128xi32>
    %273 = vector.broadcast %272 : vector<1x128xi32> to vector<16x128xi32>
    %274 = arith.cmpi eq, %5, %273 : vector<16x128xi32>
    %cst_70 = arith.constant 0.000000e+00 : f32
    %275 = vector.shape_cast %235 : vector<1x128xf32> to vector<1x128xf32>
    %276 = vector.broadcast %275 : vector<1x128xf32> to vector<16x128xf32>
    %277 = vector.broadcast %cst_70 : f32 to vector<16x128xf32>
    %278 = arith.select %274, %276, %277 : vector<16x128xi1>, vector<16x128xf32>
    %279 = arith.addf %270, %278 : vector<16x128xf32>
    %cst_71 = arith.constant dense<0.000000e+00> : vector<64x128xf32>
    %280 = tpu.matmul %1, %279, %cst_71 {dimension_numbers = #tpu.dot_dimension_numbers<[1], [0], [0], [1], [0, 0, 1, 1], [], []>} : vector<64x16xf32>, vector<16x128xf32>, vector<64x128xf32> -> vector<64x128xf32>
    %281 = vector.shape_cast %280 : vector<64x128xf32> to vector<4x16x128xf32>
    %282 = vector.shape_cast %262 : vector<16x128xf32> to vector<1x16x128xf32>
    %283 = vector.broadcast %282 : vector<1x16x128xf32> to vector<4x16x128xf32>
    %284 = arith.mulf %281, %283 : vector<4x16x128xf32>
    %cst_72 = arith.constant dense<0.000000e+00> : vector<4x128xf32>
    %285 = vector.multi_reduction <add>, %284, %cst_72 [1] : vector<4x16x128xf32> to vector<4x128xf32>
    %286 = vector.extract_strided_slice %3 {offsets = [5, 0], sizes = [1, 128], strides = [1, 1]} : vector<18x128xf32> to vector<1x128xf32>
    %287 = vector.extract_strided_slice %3 {offsets = [14, 0], sizes = [1, 128], strides = [1, 1]} : vector<18x128xf32> to vector<1x128xf32>
    %288 = math.floor %286 : vector<1x128xf32>
    %289 = math.floor %287 : vector<1x128xf32>
    %290 = arith.subf %286, %288 : vector<1x128xf32>
    %291 = arith.subf %287, %289 : vector<1x128xf32>
    %cst_73 = arith.constant -2.000000e+00 : f32
    %cst_74 = arith.constant 1.600000e+01 : f32
    %292 = vector.broadcast %cst_73 : f32 to vector<1x128xf32>
    %293 = arith.maximumf %292, %288 : vector<1x128xf32>
    %294 = vector.broadcast %cst_74 : f32 to vector<1x128xf32>
    %295 = arith.minimumf %294, %293 : vector<1x128xf32>
    %296 = arith.fptosi %295 : vector<1x128xf32> to vector<1x128xi32>
    %cst_75 = arith.constant -2.000000e+00 : f32
    %cst_76 = arith.constant 1.600000e+01 : f32
    %297 = vector.broadcast %cst_75 : f32 to vector<1x128xf32>
    %298 = arith.maximumf %297, %289 : vector<1x128xf32>
    %299 = vector.broadcast %cst_76 : f32 to vector<1x128xf32>
    %300 = arith.minimumf %299, %298 : vector<1x128xf32>
    %301 = arith.fptosi %300 : vector<1x128xf32> to vector<1x128xi32>
    %302 = vector.broadcast %296 : vector<1x128xi32> to vector<16x128xi32>
    %303 = arith.cmpi eq, %4, %302 : vector<16x128xi32>
    %cst_77 = arith.constant 1.000000e+00 : f32
    %304 = vector.broadcast %cst_77 : f32 to vector<1x128xf32>
    %305 = arith.subf %304, %290 : vector<1x128xf32>
    %cst_78 = arith.constant 0.000000e+00 : f32
    %306 = vector.shape_cast %305 : vector<1x128xf32> to vector<1x128xf32>
    %307 = vector.broadcast %306 : vector<1x128xf32> to vector<16x128xf32>
    %308 = vector.broadcast %cst_78 : f32 to vector<16x128xf32>
    %309 = arith.select %303, %307, %308 : vector<16x128xi1>, vector<16x128xf32>
    %c1_i32_79 = arith.constant 1 : i32
    %310 = vector.broadcast %c1_i32_79 : i32 to vector<1x128xi32>
    %311 = arith.addi %296, %310 : vector<1x128xi32>
    %312 = vector.broadcast %311 : vector<1x128xi32> to vector<16x128xi32>
    %313 = arith.cmpi eq, %4, %312 : vector<16x128xi32>
    %cst_80 = arith.constant 0.000000e+00 : f32
    %314 = vector.shape_cast %290 : vector<1x128xf32> to vector<1x128xf32>
    %315 = vector.broadcast %314 : vector<1x128xf32> to vector<16x128xf32>
    %316 = vector.broadcast %cst_80 : f32 to vector<16x128xf32>
    %317 = arith.select %313, %315, %316 : vector<16x128xi1>, vector<16x128xf32>
    %318 = arith.addf %309, %317 : vector<16x128xf32>
    %319 = vector.broadcast %301 : vector<1x128xi32> to vector<16x128xi32>
    %320 = arith.cmpi eq, %5, %319 : vector<16x128xi32>
    %cst_81 = arith.constant 1.000000e+00 : f32
    %321 = vector.broadcast %cst_81 : f32 to vector<1x128xf32>
    %322 = arith.subf %321, %291 : vector<1x128xf32>
    %cst_82 = arith.constant 0.000000e+00 : f32
    %323 = vector.shape_cast %322 : vector<1x128xf32> to vector<1x128xf32>
    %324 = vector.broadcast %323 : vector<1x128xf32> to vector<16x128xf32>
    %325 = vector.broadcast %cst_82 : f32 to vector<16x128xf32>
    %326 = arith.select %320, %324, %325 : vector<16x128xi1>, vector<16x128xf32>
    %c1_i32_83 = arith.constant 1 : i32
    %327 = vector.broadcast %c1_i32_83 : i32 to vector<1x128xi32>
    %328 = arith.addi %301, %327 : vector<1x128xi32>
    %329 = vector.broadcast %328 : vector<1x128xi32> to vector<16x128xi32>
    %330 = arith.cmpi eq, %5, %329 : vector<16x128xi32>
    %cst_84 = arith.constant 0.000000e+00 : f32
    %331 = vector.shape_cast %291 : vector<1x128xf32> to vector<1x128xf32>
    %332 = vector.broadcast %331 : vector<1x128xf32> to vector<16x128xf32>
    %333 = vector.broadcast %cst_84 : f32 to vector<16x128xf32>
    %334 = arith.select %330, %332, %333 : vector<16x128xi1>, vector<16x128xf32>
    %335 = arith.addf %326, %334 : vector<16x128xf32>
    %cst_85 = arith.constant dense<0.000000e+00> : vector<64x128xf32>
    %336 = tpu.matmul %1, %335, %cst_85 {dimension_numbers = #tpu.dot_dimension_numbers<[1], [0], [0], [1], [0, 0, 1, 1], [], []>} : vector<64x16xf32>, vector<16x128xf32>, vector<64x128xf32> -> vector<64x128xf32>
    %337 = vector.shape_cast %336 : vector<64x128xf32> to vector<4x16x128xf32>
    %338 = vector.shape_cast %318 : vector<16x128xf32> to vector<1x16x128xf32>
    %339 = vector.broadcast %338 : vector<1x16x128xf32> to vector<4x16x128xf32>
    %340 = arith.mulf %337, %339 : vector<4x16x128xf32>
    %cst_86 = arith.constant dense<0.000000e+00> : vector<4x128xf32>
    %341 = vector.multi_reduction <add>, %340, %cst_86 [1] : vector<4x16x128xf32> to vector<4x128xf32>
    %342 = vector.extract_strided_slice %3 {offsets = [6, 0], sizes = [1, 128], strides = [1, 1]} : vector<18x128xf32> to vector<1x128xf32>
    %343 = vector.extract_strided_slice %3 {offsets = [15, 0], sizes = [1, 128], strides = [1, 1]} : vector<18x128xf32> to vector<1x128xf32>
    %344 = math.floor %342 : vector<1x128xf32>
    %345 = math.floor %343 : vector<1x128xf32>
    %346 = arith.subf %342, %344 : vector<1x128xf32>
    %347 = arith.subf %343, %345 : vector<1x128xf32>
    %cst_87 = arith.constant -2.000000e+00 : f32
    %cst_88 = arith.constant 1.600000e+01 : f32
    %348 = vector.broadcast %cst_87 : f32 to vector<1x128xf32>
    %349 = arith.maximumf %348, %344 : vector<1x128xf32>
    %350 = vector.broadcast %cst_88 : f32 to vector<1x128xf32>
    %351 = arith.minimumf %350, %349 : vector<1x128xf32>
    %352 = arith.fptosi %351 : vector<1x128xf32> to vector<1x128xi32>
    %cst_89 = arith.constant -2.000000e+00 : f32
    %cst_90 = arith.constant 1.600000e+01 : f32
    %353 = vector.broadcast %cst_89 : f32 to vector<1x128xf32>
    %354 = arith.maximumf %353, %345 : vector<1x128xf32>
    %355 = vector.broadcast %cst_90 : f32 to vector<1x128xf32>
    %356 = arith.minimumf %355, %354 : vector<1x128xf32>
    %357 = arith.fptosi %356 : vector<1x128xf32> to vector<1x128xi32>
    %358 = vector.broadcast %352 : vector<1x128xi32> to vector<16x128xi32>
    %359 = arith.cmpi eq, %4, %358 : vector<16x128xi32>
    %cst_91 = arith.constant 1.000000e+00 : f32
    %360 = vector.broadcast %cst_91 : f32 to vector<1x128xf32>
    %361 = arith.subf %360, %346 : vector<1x128xf32>
    %cst_92 = arith.constant 0.000000e+00 : f32
    %362 = vector.shape_cast %361 : vector<1x128xf32> to vector<1x128xf32>
    %363 = vector.broadcast %362 : vector<1x128xf32> to vector<16x128xf32>
    %364 = vector.broadcast %cst_92 : f32 to vector<16x128xf32>
    %365 = arith.select %359, %363, %364 : vector<16x128xi1>, vector<16x128xf32>
    %c1_i32_93 = arith.constant 1 : i32
    %366 = vector.broadcast %c1_i32_93 : i32 to vector<1x128xi32>
    %367 = arith.addi %352, %366 : vector<1x128xi32>
    %368 = vector.broadcast %367 : vector<1x128xi32> to vector<16x128xi32>
    %369 = arith.cmpi eq, %4, %368 : vector<16x128xi32>
    %cst_94 = arith.constant 0.000000e+00 : f32
    %370 = vector.shape_cast %346 : vector<1x128xf32> to vector<1x128xf32>
    %371 = vector.broadcast %370 : vector<1x128xf32> to vector<16x128xf32>
    %372 = vector.broadcast %cst_94 : f32 to vector<16x128xf32>
    %373 = arith.select %369, %371, %372 : vector<16x128xi1>, vector<16x128xf32>
    %374 = arith.addf %365, %373 : vector<16x128xf32>
    %375 = vector.broadcast %357 : vector<1x128xi32> to vector<16x128xi32>
    %376 = arith.cmpi eq, %5, %375 : vector<16x128xi32>
    %cst_95 = arith.constant 1.000000e+00 : f32
    %377 = vector.broadcast %cst_95 : f32 to vector<1x128xf32>
    %378 = arith.subf %377, %347 : vector<1x128xf32>
    %cst_96 = arith.constant 0.000000e+00 : f32
    %379 = vector.shape_cast %378 : vector<1x128xf32> to vector<1x128xf32>
    %380 = vector.broadcast %379 : vector<1x128xf32> to vector<16x128xf32>
    %381 = vector.broadcast %cst_96 : f32 to vector<16x128xf32>
    %382 = arith.select %376, %380, %381 : vector<16x128xi1>, vector<16x128xf32>
    %c1_i32_97 = arith.constant 1 : i32
    %383 = vector.broadcast %c1_i32_97 : i32 to vector<1x128xi32>
    %384 = arith.addi %357, %383 : vector<1x128xi32>
    %385 = vector.broadcast %384 : vector<1x128xi32> to vector<16x128xi32>
    %386 = arith.cmpi eq, %5, %385 : vector<16x128xi32>
    %cst_98 = arith.constant 0.000000e+00 : f32
    %387 = vector.shape_cast %347 : vector<1x128xf32> to vector<1x128xf32>
    %388 = vector.broadcast %387 : vector<1x128xf32> to vector<16x128xf32>
    %389 = vector.broadcast %cst_98 : f32 to vector<16x128xf32>
    %390 = arith.select %386, %388, %389 : vector<16x128xi1>, vector<16x128xf32>
    %391 = arith.addf %382, %390 : vector<16x128xf32>
    %cst_99 = arith.constant dense<0.000000e+00> : vector<64x128xf32>
    %392 = tpu.matmul %1, %391, %cst_99 {dimension_numbers = #tpu.dot_dimension_numbers<[1], [0], [0], [1], [0, 0, 1, 1], [], []>} : vector<64x16xf32>, vector<16x128xf32>, vector<64x128xf32> -> vector<64x128xf32>
    %393 = vector.shape_cast %392 : vector<64x128xf32> to vector<4x16x128xf32>
    %394 = vector.shape_cast %374 : vector<16x128xf32> to vector<1x16x128xf32>
    %395 = vector.broadcast %394 : vector<1x16x128xf32> to vector<4x16x128xf32>
    %396 = arith.mulf %393, %395 : vector<4x16x128xf32>
    %cst_100 = arith.constant dense<0.000000e+00> : vector<4x128xf32>
    %397 = vector.multi_reduction <add>, %396, %cst_100 [1] : vector<4x16x128xf32> to vector<4x128xf32>
    %398 = vector.extract_strided_slice %3 {offsets = [7, 0], sizes = [1, 128], strides = [1, 1]} : vector<18x128xf32> to vector<1x128xf32>
    %399 = vector.extract_strided_slice %3 {offsets = [16, 0], sizes = [1, 128], strides = [1, 1]} : vector<18x128xf32> to vector<1x128xf32>
    %400 = math.floor %398 : vector<1x128xf32>
    %401 = math.floor %399 : vector<1x128xf32>
    %402 = arith.subf %398, %400 : vector<1x128xf32>
    %403 = arith.subf %399, %401 : vector<1x128xf32>
    %cst_101 = arith.constant -2.000000e+00 : f32
    %cst_102 = arith.constant 1.600000e+01 : f32
    %404 = vector.broadcast %cst_101 : f32 to vector<1x128xf32>
    %405 = arith.maximumf %404, %400 : vector<1x128xf32>
    %406 = vector.broadcast %cst_102 : f32 to vector<1x128xf32>
    %407 = arith.minimumf %406, %405 : vector<1x128xf32>
    %408 = arith.fptosi %407 : vector<1x128xf32> to vector<1x128xi32>
    %cst_103 = arith.constant -2.000000e+00 : f32
    %cst_104 = arith.constant 1.600000e+01 : f32
    %409 = vector.broadcast %cst_103 : f32 to vector<1x128xf32>
    %410 = arith.maximumf %409, %401 : vector<1x128xf32>
    %411 = vector.broadcast %cst_104 : f32 to vector<1x128xf32>
    %412 = arith.minimumf %411, %410 : vector<1x128xf32>
    %413 = arith.fptosi %412 : vector<1x128xf32> to vector<1x128xi32>
    %414 = vector.broadcast %408 : vector<1x128xi32> to vector<16x128xi32>
    %415 = arith.cmpi eq, %4, %414 : vector<16x128xi32>
    %cst_105 = arith.constant 1.000000e+00 : f32
    %416 = vector.broadcast %cst_105 : f32 to vector<1x128xf32>
    %417 = arith.subf %416, %402 : vector<1x128xf32>
    %cst_106 = arith.constant 0.000000e+00 : f32
    %418 = vector.shape_cast %417 : vector<1x128xf32> to vector<1x128xf32>
    %419 = vector.broadcast %418 : vector<1x128xf32> to vector<16x128xf32>
    %420 = vector.broadcast %cst_106 : f32 to vector<16x128xf32>
    %421 = arith.select %415, %419, %420 : vector<16x128xi1>, vector<16x128xf32>
    %c1_i32_107 = arith.constant 1 : i32
    %422 = vector.broadcast %c1_i32_107 : i32 to vector<1x128xi32>
    %423 = arith.addi %408, %422 : vector<1x128xi32>
    %424 = vector.broadcast %423 : vector<1x128xi32> to vector<16x128xi32>
    %425 = arith.cmpi eq, %4, %424 : vector<16x128xi32>
    %cst_108 = arith.constant 0.000000e+00 : f32
    %426 = vector.shape_cast %402 : vector<1x128xf32> to vector<1x128xf32>
    %427 = vector.broadcast %426 : vector<1x128xf32> to vector<16x128xf32>
    %428 = vector.broadcast %cst_108 : f32 to vector<16x128xf32>
    %429 = arith.select %425, %427, %428 : vector<16x128xi1>, vector<16x128xf32>
    %430 = arith.addf %421, %429 : vector<16x128xf32>
    %431 = vector.broadcast %413 : vector<1x128xi32> to vector<16x128xi32>
    %432 = arith.cmpi eq, %5, %431 : vector<16x128xi32>
    %cst_109 = arith.constant 1.000000e+00 : f32
    %433 = vector.broadcast %cst_109 : f32 to vector<1x128xf32>
    %434 = arith.subf %433, %403 : vector<1x128xf32>
    %cst_110 = arith.constant 0.000000e+00 : f32
    %435 = vector.shape_cast %434 : vector<1x128xf32> to vector<1x128xf32>
    %436 = vector.broadcast %435 : vector<1x128xf32> to vector<16x128xf32>
    %437 = vector.broadcast %cst_110 : f32 to vector<16x128xf32>
    %438 = arith.select %432, %436, %437 : vector<16x128xi1>, vector<16x128xf32>
    %c1_i32_111 = arith.constant 1 : i32
    %439 = vector.broadcast %c1_i32_111 : i32 to vector<1x128xi32>
    %440 = arith.addi %413, %439 : vector<1x128xi32>
    %441 = vector.broadcast %440 : vector<1x128xi32> to vector<16x128xi32>
    %442 = arith.cmpi eq, %5, %441 : vector<16x128xi32>
    %cst_112 = arith.constant 0.000000e+00 : f32
    %443 = vector.shape_cast %403 : vector<1x128xf32> to vector<1x128xf32>
    %444 = vector.broadcast %443 : vector<1x128xf32> to vector<16x128xf32>
    %445 = vector.broadcast %cst_112 : f32 to vector<16x128xf32>
    %446 = arith.select %442, %444, %445 : vector<16x128xi1>, vector<16x128xf32>
    %447 = arith.addf %438, %446 : vector<16x128xf32>
    %cst_113 = arith.constant dense<0.000000e+00> : vector<64x128xf32>
    %448 = tpu.matmul %1, %447, %cst_113 {dimension_numbers = #tpu.dot_dimension_numbers<[1], [0], [0], [1], [0, 0, 1, 1], [], []>} : vector<64x16xf32>, vector<16x128xf32>, vector<64x128xf32> -> vector<64x128xf32>
    %449 = vector.shape_cast %448 : vector<64x128xf32> to vector<4x16x128xf32>
    %450 = vector.shape_cast %430 : vector<16x128xf32> to vector<1x16x128xf32>
    %451 = vector.broadcast %450 : vector<1x16x128xf32> to vector<4x16x128xf32>
    %452 = arith.mulf %449, %451 : vector<4x16x128xf32>
    %cst_114 = arith.constant dense<0.000000e+00> : vector<4x128xf32>
    %453 = vector.multi_reduction <add>, %452, %cst_114 [1] : vector<4x16x128xf32> to vector<4x128xf32>
    %454 = vector.extract_strided_slice %3 {offsets = [8, 0], sizes = [1, 128], strides = [1, 1]} : vector<18x128xf32> to vector<1x128xf32>
    %455 = vector.extract_strided_slice %3 {offsets = [17, 0], sizes = [1, 128], strides = [1, 1]} : vector<18x128xf32> to vector<1x128xf32>
    %456 = math.floor %454 : vector<1x128xf32>
    %457 = math.floor %455 : vector<1x128xf32>
    %458 = arith.subf %454, %456 : vector<1x128xf32>
    %459 = arith.subf %455, %457 : vector<1x128xf32>
    %cst_115 = arith.constant -2.000000e+00 : f32
    %cst_116 = arith.constant 1.600000e+01 : f32
    %460 = vector.broadcast %cst_115 : f32 to vector<1x128xf32>
    %461 = arith.maximumf %460, %456 : vector<1x128xf32>
    %462 = vector.broadcast %cst_116 : f32 to vector<1x128xf32>
    %463 = arith.minimumf %462, %461 : vector<1x128xf32>
    %464 = arith.fptosi %463 : vector<1x128xf32> to vector<1x128xi32>
    %cst_117 = arith.constant -2.000000e+00 : f32
    %cst_118 = arith.constant 1.600000e+01 : f32
    %465 = vector.broadcast %cst_117 : f32 to vector<1x128xf32>
    %466 = arith.maximumf %465, %457 : vector<1x128xf32>
    %467 = vector.broadcast %cst_118 : f32 to vector<1x128xf32>
    %468 = arith.minimumf %467, %466 : vector<1x128xf32>
    %469 = arith.fptosi %468 : vector<1x128xf32> to vector<1x128xi32>
    %470 = vector.broadcast %464 : vector<1x128xi32> to vector<16x128xi32>
    %471 = arith.cmpi eq, %4, %470 : vector<16x128xi32>
    %cst_119 = arith.constant 1.000000e+00 : f32
    %472 = vector.broadcast %cst_119 : f32 to vector<1x128xf32>
    %473 = arith.subf %472, %458 : vector<1x128xf32>
    %cst_120 = arith.constant 0.000000e+00 : f32
    %474 = vector.shape_cast %473 : vector<1x128xf32> to vector<1x128xf32>
    %475 = vector.broadcast %474 : vector<1x128xf32> to vector<16x128xf32>
    %476 = vector.broadcast %cst_120 : f32 to vector<16x128xf32>
    %477 = arith.select %471, %475, %476 : vector<16x128xi1>, vector<16x128xf32>
    %c1_i32_121 = arith.constant 1 : i32
    %478 = vector.broadcast %c1_i32_121 : i32 to vector<1x128xi32>
    %479 = arith.addi %464, %478 : vector<1x128xi32>
    %480 = vector.broadcast %479 : vector<1x128xi32> to vector<16x128xi32>
    %481 = arith.cmpi eq, %4, %480 : vector<16x128xi32>
    %cst_122 = arith.constant 0.000000e+00 : f32
    %482 = vector.shape_cast %458 : vector<1x128xf32> to vector<1x128xf32>
    %483 = vector.broadcast %482 : vector<1x128xf32> to vector<16x128xf32>
    %484 = vector.broadcast %cst_122 : f32 to vector<16x128xf32>
    %485 = arith.select %481, %483, %484 : vector<16x128xi1>, vector<16x128xf32>
    %486 = arith.addf %477, %485 : vector<16x128xf32>
    %487 = vector.broadcast %469 : vector<1x128xi32> to vector<16x128xi32>
    %488 = arith.cmpi eq, %5, %487 : vector<16x128xi32>
    %cst_123 = arith.constant 1.000000e+00 : f32
    %489 = vector.broadcast %cst_123 : f32 to vector<1x128xf32>
    %490 = arith.subf %489, %459 : vector<1x128xf32>
    %cst_124 = arith.constant 0.000000e+00 : f32
    %491 = vector.shape_cast %490 : vector<1x128xf32> to vector<1x128xf32>
    %492 = vector.broadcast %491 : vector<1x128xf32> to vector<16x128xf32>
    %493 = vector.broadcast %cst_124 : f32 to vector<16x128xf32>
    %494 = arith.select %488, %492, %493 : vector<16x128xi1>, vector<16x128xf32>
    %c1_i32_125 = arith.constant 1 : i32
    %495 = vector.broadcast %c1_i32_125 : i32 to vector<1x128xi32>
    %496 = arith.addi %469, %495 : vector<1x128xi32>
    %497 = vector.broadcast %496 : vector<1x128xi32> to vector<16x128xi32>
    %498 = arith.cmpi eq, %5, %497 : vector<16x128xi32>
    %cst_126 = arith.constant 0.000000e+00 : f32
    %499 = vector.shape_cast %459 : vector<1x128xf32> to vector<1x128xf32>
    %500 = vector.broadcast %499 : vector<1x128xf32> to vector<16x128xf32>
    %501 = vector.broadcast %cst_126 : f32 to vector<16x128xf32>
    %502 = arith.select %498, %500, %501 : vector<16x128xi1>, vector<16x128xf32>
    %503 = arith.addf %494, %502 : vector<16x128xf32>
    %cst_127 = arith.constant dense<0.000000e+00> : vector<64x128xf32>
    %504 = tpu.matmul %1, %503, %cst_127 {dimension_numbers = #tpu.dot_dimension_numbers<[1], [0], [0], [1], [0, 0, 1, 1], [], []>} : vector<64x16xf32>, vector<16x128xf32>, vector<64x128xf32> -> vector<64x128xf32>
    %505 = vector.shape_cast %504 : vector<64x128xf32> to vector<4x16x128xf32>
    %506 = vector.shape_cast %486 : vector<16x128xf32> to vector<1x16x128xf32>
    %507 = vector.broadcast %506 : vector<1x16x128xf32> to vector<4x16x128xf32>
    %508 = arith.mulf %505, %507 : vector<4x16x128xf32>
    %cst_128 = arith.constant dense<0.000000e+00> : vector<4x128xf32>
    %509 = vector.multi_reduction <add>, %508, %cst_128 [1] : vector<4x16x128xf32> to vector<4x128xf32>
    %510 = tpu.concatenate %61, %117, %173, %229, %285, %341, %397, %453, %509 in 0 : vector<4x128xf32>, vector<4x128xf32>, vector<4x128xf32>, vector<4x128xf32>, vector<4x128xf32>, vector<4x128xf32>, vector<4x128xf32>, vector<4x128xf32>, vector<4x128xf32> -> vector<36x128xf32>
    %c0_129 = arith.constant 0 : index
    %c0_130 = arith.constant 0 : index
    %511 = vector.load %arg4[%c0_129, %c0_130] : memref<8x36xf32, #tpu.memory_space<vmem>>, vector<8x36xf32>
    %cst_131 = arith.constant dense<0.000000e+00> : vector<8x128xf32>
    %512 = tpu.matmul %511, %510, %cst_131 {dimension_numbers = #tpu.dot_dimension_numbers<[1], [0], [0], [1], [0, 0, 1, 1], [], []>} : vector<8x36xf32>, vector<36x128xf32>, vector<8x128xf32> -> vector<8x128xf32>
    %cst_132 = arith.constant 0.000000e+00 : f32
    %513 = vector.broadcast %cst_132 : f32 to vector<8x128xf32>
    %514 = arith.maximumf %512, %513 : vector<8x128xf32>
    %c0_133 = arith.constant 0 : index
    %c0_134 = arith.constant 0 : index
    %c0_135 = arith.constant 0 : index
    %515 = vector.load %arg5[%c0_133, %c0_134, %c0_135] : memref<1x8x128xf32, #tpu.memory_space<vmem>>, vector<1x8x128xf32>
    %516 = vector.shape_cast %515 : vector<1x8x128xf32> to vector<8x128xf32>
    %517 = vector.shape_cast %514 : vector<8x128xf32> to vector<1x8x128xf32>
    tpu.vector_store %arg5[%c0_133, %c0_134, %c0_135], %517 {strides = array<i32>} : memref<1x8x128xf32, #tpu.memory_space<vmem>>, vector<1x8x128xf32>,
    return
  }
  func.func @transform_0(%arg0: i32, %arg1: i32) -> (i32, i32, i32) {
    %c0_i32 = arith.constant 0 : i32
    %c0_i32_0 = arith.constant 0 : i32
    %c0_i32_1 = arith.constant 0 : i32
    return %arg0, %c0_i32, %c0_i32_0 : i32, i32, i32
  }
  func.func @transform_1(%arg0: i32, %arg1: i32) -> (i32, i32, i32) {
    %c0_i32 = arith.constant 0 : i32
    %c0_i32_0 = arith.constant 0 : i32
    return %arg0, %c0_i32, %arg1 : i32, i32, i32
  }
  func.func @transform_2(%arg0: i32, %arg1: i32) -> (i32, i32) {
    %c0_i32 = arith.constant 0 : i32
    %c0_i32_0 = arith.constant 0 : i32
    %c0_i32_1 = arith.constant 0 : i32
    return %c0_i32, %c0_i32_0 : i32, i32
  }
  func.func @transform_3(%arg0: i32, %arg1: i32) -> (i32, i32, i32) {
    %c0_i32 = arith.constant 0 : i32
    %c0_i32_0 = arith.constant 0 : i32
    return %arg0, %c0_i32, %arg1 : i32, i32, i32
  }
}

</mosaic_0001>

<bundles_post_ra>
// kernel: mul.34
= control target key start
LH: loop header
LB: loop body
LE: loop exit
PB: predicated region body
PF: predicated region fallthrough
CT: control target
= control target key end

     0   :  { %vm8_vm0 = vcmask 23552   ;;  %s33_s8 = smov 3   ;;  %vm14_vm1 = vcmask 72752   ;;  %vm20_vm2 = vcmask 48152   ;;  %s50_s0 = inlined_call_operand.vmem [shape: f32[3,3], index: 0, kind: input, shape index: {}]   ;;  %s51_s1 = inlined_call_operand.vmem [shape: f32[9], index: 1, kind: output, shape index: {}]  }
   0x1   :  { %v5_v0 = vld [vmem:[%s50_s0] sm:$0xf]  ;;  %s32_s0 = smov 6  }
   0x2   :  { %6 = vst [vmem:[#allocation1] sm:$0xf] %v5_v0 }
   0x9   :  { %v11_v1 = vld [vmem:[#allocation1 + $0x2] sm:$0x1]   ;;  %v7_v2 = vld [vmem:[#allocation1] sm:$0x1]   ;;  %v17_v3 = vld [vmem:[#allocation1 + $0x1] sm:$0x1]  }
   0xa   :  { %12 = vrot.lane.b32.xlu0 %v11_v1, %s32_s0  ;;  %9 = vst.msk [vmem:[#allocation0] sm:$0x1] %vm8_vm0, %v7_v2  }
   0xe   :  { %18 = vrot.lane.b32.xlu0 %v17_v3, %s33_s8 }
  0x7c   :  { %v13_v4 = vpop.permute.xlu0 %12  }
  0x7d   :  { %15 = vst.msk [vmem:[#allocation0] sm:$0x1] %vm14_vm1, %v13_v4  }
  0x80   :  { %v19_v5 = vpop.permute.xlu0 %18  }
  0x81   :  { %21 = vst.msk [vmem:[#allocation0] sm:$0x1] %vm20_vm2, %v19_v5  }
  0x88   :  { %v26_v6 = vld [vmem:[#allocation0] sm:$0x1] }
  0x89   :  { %29 = vst [vmem:[%s51_s1] sm:$0x1] %v26_v6 }

// kernel: align_conv_forward.1
= control target key start
LH: loop header
LB: loop body
LE: loop exit
PB: predicated region body
PF: predicated region fallthrough
CT: control target
= control target key end

     0   :  { %s2805_s12 = smov 0   ;;  %s2807_s13 = smov 0   ;;  %s3695_s0 = inlined_call_operand.vmem [shape: f32[2,64,16], index: 0, kind: input, shape index: {}]   ;;  %s3696_s1 = inlined_call_operand.vmem [shape: f32[2,18,256], index: 1, kind: input, shape index: {}]   ;;  %s3697_s2 = inlined_call_operand.vmem [shape: f32[8,36], index: 2, kind: input, shape index: {}]   ;;  %s3698_s3 = inlined_call_operand.vmem [shape: f32[2,8,256], index: 3, kind: output, shape index: {}]  }
   0x1   :  { %s2809_s14 = smov 0   ;;  %s2811_s15 = smov 0  }
   0x2   :  { %s2813_s16 = smov 0   ;;  %s2815_s17 = smov 0  }
   0x3   :  { %s2817_s18 = smov 0  }
   0x4 LB: > { %s22_s19 = sadd.s32 1, %s2773_s16  ;;  %s25_s20 = sadd.s32 1, %s2777_s17  ;;  %s2781_s18 = sphi %s2817_s18, %s13_s18   ;;  %s2777_s17 = sphi %s2815_s17, %s3713_s17   ;;  %s2773_s16 = sphi %s2813_s16, %s3712_s16   ;;  %s2769_s15 = sphi %s2811_s15, %s3711_s15   ;;  %s2765_s14 = sphi %s2809_s14, %s3710_s14   ;;  %s2761_s13 = sphi %s2807_s13, %s3709_s13   ;;  %s2757_s12 = sphi %s2805_s12, %s3708_s12  }
   0x5   : > { %p23_p0 = scmp.ge.s32.totalorder %s22_s19, 2  ;;  %p67_p1 = scmp.ne.s32.totalorder %s2761_s13, %s2757_s12 }
   0x6   : > { %p68_p2 = scmp.eq.s32.totalorder %s2781_s18, 0  ;;  %s60_s24 = sadd.s32 1, %s2761_s13 }
   0x7   : > { %s3715_s19 = smov (%p23_p0, %s22_s19), 0  ;;  %s3717_s20 = smov (!%p23_p0, %s25_s20), %s2777_s17 }
   0x8   : > { %p69_p3 = por %p68_p2, %p67_p1  ;;  %p27_p4 = scmp.ge.s32.totalorder %s3717_s20, 2 }
   0x9   : > { %s56_s21 = ssub.s32 %s2773_s16, %s3715_s19  ;;  %p2319_p6 = scmp.ge.s32.totalorder %s2781_s18, 4 }
   0xa   : > { %s3719_s20 = smov (%p27_p4, %s3717_s20), 0 }
   0xb   : > { %s55_s22 = ssub.s32 %s2777_s17, %s3719_s20  ;;  %145 = sbr.rel (%p2319_p6) target bundleno = 25 (0x19), region = 20 }
   0xc   : > { %s57_s23 = sor.u32 %s56_s21, %s55_s22 }
   0xd   : > { %p58_p5 = scmp.eq.s32.totalorder %s57_s23, 0 }
   0xf   : > { %s2856_s25 = scalar_select %p58_p5, %s2761_s13, %s60_s24  }
  0x10   : > { %156 = sbr.rel (!%p69_p3) target bundleno = 25 (0x19), region = 28  ;;  %s158_s26 = sand.u32 (%p69_p3), 1, %s2761_s13  }
  0x11   : > { %s2661_s27 = smul.u32 (%p69_p3), 6, %s2777_s17 }
  0x12   : > { %s2660_s28 = smul.u32 (%p69_p3), 24, %s158_s26 }
  0x13   : > { %s162_s29 = sadd.s32 (%p69_p3), %s2773_s16, %s2661_s27 }
  0x14   : > { %s2320_s30 = sshll.u32 (%p69_p3), %s162_s29, 3  ;;  %s160_s7 = scalar_lea.vmem (%p69_p3), [#allocation2], %s2660_s28 }
  0x15   : > { %s164_s6 = scalar_lea.vmem %s3696_s1, %s2320_s30 }
  0x16   : > { %v197_v0 = vld [vmem:[%s164_s6] sm:$0xff]  ;;  %v199_v1 = vld [vmem:[%s164_s6 + $0x10] sm:$0xff] }
  0x17   : > { %v201_v2 = vld [vmem:[%s164_s6 + $0x20] sm:$0xff]  ;;  %198 = vst [vmem:[%s160_s7] sm:$0xff] %v197_v0  ;;  %200 = vst [vmem:[%s160_s7 + $0x8] sm:$0xff] %v199_v1 }
  0x18   : > { %202 = vst [vmem:[%s160_s7 + $0x10] sm:$0xff] %v201_v2 }
  0x19 PF: > { %p2321_p7 = scmp.ge.s32.totalorder %s2781_s18, 1  ;;  %p207_p8 = scmp.lt.s32.totalorder %s2781_s18, 5 }
  0x1b   : > { %p208_p9 = pnand %p2321_p7, %p207_p8 }
  0x1d   : > { %211 = sbr.rel (%p208_p9) target bundleno = 553 (0x229), region = 66 }
  0x22   : > { %s214_s8 = sand.u32 1, %s2757_s12   ;;  %p245_p10 = scmp.lt.s32.totalorder %s2769_s15, 1  ;;  %v269_v3 = vlaneseq  ;;  %vm338_vm0 = vcmask 130048  }
  0x23   : > { %s2662_s9 = smul.u32 24, %s214_s8  ;;  %p252_p11 = scmp.lt.s32.totalorder %s2765_s14, 1 }
  0x24   : > { %s3721_s15 = smov (!%p245_p10, %s2769_s15), 1  ;;  %v2876_v5 = vshrl.u32 %v269_v3, 7 }
  0x25   : > { %s2872_s10 = scalar_lea.vmem [#allocation2], %s2662_s9  ;;  %s2402_s11 = sshll.u32 %s3721_s15, 6 }
  0x26   : > { %v267_v4 = vld [vmem:[%s2872_s10 + $0x8] sm:$0xff]  ;;  %s2881_s12 = scalar_lea.vmem %s3695_s0, %s2402_s11  ;;  %v2890_v9 = vld [vmem:[%s2872_s10 + $0x10] sm:$0x3]  ;;  %v2899_v13 = vsub.s32 1, %v2876_v5  ;;  %v2906_v16 = vsub.s32 2, %v2876_v5  ;;  %v2909_v17 = vsub.s32 3, %v2876_v5 }
  0x27   : > { %v273_v6 = vfloor.f32 %v267_v4  ;;  %v2884_v7 = vld [vmem:[%s2881_s12] sm:$0xff]  ;;  %v2887_v8 = vld [vmem:[%s2881_s12 + $0x30] sm:$0xff]  ;;  %v1662_v14 = vfloor.f32 %v2890_v9  ;;  %v2912_v18 = vsub.s32 4, %v2876_v5  ;;  %v2915_v20 = vsub.s32 5, %v2876_v5  ;;  %v2993_v55 = vld [vmem:[%s2881_s12 + $0x8] sm:$0xff]  ;;  %s3723_s14 = smov (!%p252_p11, %s2765_s14), 1 }
  0x28   : > { %2503 = vmatprep.mubr.msk.f32.mxu0 %vm338_vm0, %v2884_v7  ;;  %2512 = vmatprep.mubr.msk.f32.mxu1 %vm338_vm0, %v2887_v8  ;;  %v2918_v21 = vsub.s32 6, %v2876_v5  ;;  %v2921_v22 = vadd.s32 8, %v2876_v5  ;;  %v2996_v56 = vld [vmem:[%s2881_s12 + $0x38] sm:$0xff]  ;;  %v3001_v58 = vsub.s32 7, %v2876_v5  ;;  %v3004_v59 = vld [vmem:[%s2881_s12 + $0x10] sm:$0xff]  ;;  %s2324_s26 = sshll.u32 %s3721_s15, 1 }
  0x29   : > { %v2892_v10 = vsub.f32 %v267_v4, %v273_v6  ;;  %v279_v11 = vmax.f32 %v273_v6, -2.0  ;;  %v2929_v25 = vmax.f32 %v1662_v14, -2.0  ;;  %s255_s27 = sadd.s32 %s2324_s26, %s3723_s14 }
  0x2a   : > { %s2325_s28 = sshll.u32 %s255_s27, 3 }
  0x2b   : > { %v280_v12 = vmin.f32 %v279_v11, 16.0  ;;  %v2903_v15 = vsub.f32 1.0, %v2892_v10  ;;  %v333_v24 = vrot.slane %v2892_v10, %v2899_v13  ;;  %v551_v27 = vrot.slane %v2892_v10, %v2906_v16  ;;  %v3032_v11 = vld [vmem:[%s2881_s12 + $0x18] sm:$0xff]  ;;  %s257_s4 = scalar_lea.vmem %s3698_s3, %s2325_s28 }
  0x2c   : > { %v2937_v28 = vrot.slane %v2892_v10, %v2909_v17  ;;  %v2941_v29 = vrot.slane %v2892_v10, %v2912_v18  ;;  %v2958_v36 = vrot.slane %v2892_v10, %v2915_v20  ;;  %v2962_v37 = vrot.slane %v2892_v10, %v2918_v21 }
  0x2d   : > { %v2665_v19 = vtrunc.f32 %v280_v12  ;;  %v320_v26 = vrot.slane %v2903_v15, %v2899_v13  ;;  %v539_v33 = vrot.slane %v2903_v15, %v2906_v16  ;;  %v732_v35 = vrot.slane %v2903_v15, %v2909_v17 }
  0x2e   : > { %v925_v51 = vrot.slane %v2903_v15, %v2912_v18  ;;  %v1118_v62 = vrot.slane %v2903_v15, %v2915_v20  ;;  %v1665_v63 = vmin.f32 %v2929_v25, 16.0  ;;  %v3050_v25 = vrot.slane %v2903_v15, %v2918_v21 }
  0x2f   : > { %v2923_v23 = vcvt.f32.s32 %v2665_v19 }
  0x31   : > { %v313_v30 = vrot.slane %v2923_v23, %v2899_v13  ;;  %v2946_v31 = vadd.s32 1, %v2923_v23  ;;  %v533_v32 = vrot.slane %v2923_v23, %v2906_v16  ;;  %v726_v34 = vrot.slane %v2923_v23, %v2909_v17 }
  0x32   : > { %v2973_v42 = vrot.slane %v2923_v23, %v2912_v18  ;;  %v2987_v52 = vrot.slane %v2923_v23, %v2915_v20  ;;  %v3040_v19 = vrot.slane %v2923_v23, %v2918_v21 }
  0x33   : > { %vm315_vm1 = vcmp.eq.s32.totalorder %v2921_v22, %v313_v30  ;;  %v327_v38 = vrot.slane %v2946_v31, %v2899_v13  ;;  %vm314_vm2 = vcmp.eq.s32.totalorder %v2876_v5, %v313_v30  ;;  %vm535_vm3 = vcmp.eq.s32.totalorder %v2921_v22, %v533_v32 }
  0x34   : > { %v322_v39 = vsel %vm315_vm1, %v320_v26, 0.0  ;;  %v321_v40 = vsel %vm314_vm2, %v320_v26, 0.0  ;;  %v545_v41 = vrot.slane %v2946_v31, %v2906_v16  ;;  %v541_v43 = vsel %vm535_vm3, %v539_v33, 0.0 }
  0x35   : > { %vm329_vm4 = vcmp.eq.s32.totalorder %v2921_v22, %v327_v38  ;;  %vm328_vm5 = vcmp.eq.s32.totalorder %v2876_v5, %v327_v38  ;;  %vm534_vm6 = vcmp.eq.s32.totalorder %v2876_v5, %v533_v32  ;;  %vm728_vm8 = vcmp.eq.s32.totalorder %v2921_v22, %v726_v34 }
  0x36   : > { %v335_v44 = vsel %vm329_vm4, %v333_v24, 0.0  ;;  %v334_v45 = vsel %vm328_vm5, %v333_v24, 0.0  ;;  %vm547_vm7 = vcmp.eq.s32.totalorder %v2921_v22, %v545_v41  ;;  %vm546_vm9 = vcmp.eq.s32.totalorder %v2876_v5, %v545_v41  ;;  %v3045_v24 = vld [vmem:[%s2881_s12 + $0x20] sm:$0xff] }
  0x37   : > { %v337_v46 = vadd.f32 %v335_v44, %v322_v39  ;;  %v336_v47 = vadd.f32 %v334_v45, %v321_v40  ;;  %v553_v48 = vsel %vm547_vm7, %v551_v27, 0.0  ;;  %v540_v49 = vsel %vm534_vm6, %v539_v33, 0.0  ;;  %v3079_v39 = vld [vmem:[%s2881_s12 + $0x28] sm:$0xff] }
  0x38   : > { %v738_v50 = vrot.slane %v2946_v31, %v2909_v17  ;;  %v552_v53 = vsel %vm546_vm9, %v551_v27, 0.0  ;;  %v734_v54 = vsel %vm728_vm8, %v732_v35, 0.0  ;;  %vm727_vm10 = vcmp.eq.s32.totalorder %v2876_v5, %v726_v34 }
  0x39   : > { %2499 = vmatprep.subr.mxu0 %v337_v46  ;;  %2656 = vmatprep.subr.mxu1 %v337_v46  ;;  %vm921_vm11 = vcmp.eq.s32.totalorder %v2921_v22, %v2973_v42  ;;  %v555_v57 = vadd.f32 %v553_v48, %v541_v43  ;;  %v931_v61 = vrot.slane %v2946_v31, %v2912_v18  ;;  %v733_v2 = vsel %vm727_vm10, %v732_v35, 0.0 }
  0x3a   : > { %2500 = vmatpush3.msra.mxu0 %v337_v46  ;;  %2658 = vmatpush3.msra.mxu1 %v337_v46  ;;  %vm740_vm12 = vcmp.eq.s32.totalorder %v2921_v22, %v738_v50  ;;  %vm739_vm13 = vcmp.eq.s32.totalorder %v2876_v5, %v738_v50  ;;  %v554_v0 = vadd.f32 %v552_v53, %v540_v49  ;;  %v927_v3 = vsel %vm921_vm11, %v925_v51, 0.0 }
  0x3b   : > { %2501 = vmatprep.subr.mxu0 %v336_v47  ;;  %2657 = vmatprep.subr.mxu1 %v336_v47  ;;  %v746_v60 = vsel %vm740_vm12, %v2937_v28, 0.0  ;;  %v745_v4 = vsel %vm739_vm13, %v2937_v28, 0.0  ;;  %vm933_vm14 = vcmp.eq.s32.totalorder %v2921_v22, %v931_v61  ;;  %vm920_vm15 = vcmp.eq.s32.totalorder %v2876_v5, %v2973_v42 }
  0x3c   : > { %2502 = vmatpush3.msra.mxu0 %v336_v47  ;;  %2659 = vmatpush3.msra.mxu1 %v336_v47  ;;  %v748_v1 = vadd.f32 %v746_v60, %v734_v54  ;;  %v1124_v6 = vrot.slane %v2946_v31, %v2915_v20  ;;  %v939_v12 = vsel %vm933_vm14, %v2941_v29, 0.0  ;;  %vm932_vm1 = vcmp.eq.s32.totalorder %v2876_v5, %v931_v61 }
  0x3d   : > { %2504 = vmatmul.mubr.msk.f32.vlgmr.msra.gmra.mxu0 %vm338_vm0, %v2993_v55  ;;  %2513 = vmatmul.mubr.msk.f32.vlgmr.msra.gmra.mxu1 %vm338_vm0, %v2996_v56  ;;  %vm1114_vm2 = vcmp.eq.s32.totalorder %v2921_v22, %v2987_v52  ;;  %v3054_v26 = vrot.slane %v2923_v23, %v3001_v58  ;;  %v2667_v27 = vtrunc.f32 %v1665_v63  ;;  %v747_v28 = vadd.f32 %v745_v4, %v733_v2 }
  0x3e   : > { %2515 = vmatprep.subr.mxu1 %v555_v57  ;;  %2506 = vmatprep.mubr.msk.f32.mxu0 %vm338_vm0, %v3004_v59  ;;  %vm1126_vm3 = vcmp.eq.s32.totalorder %v2921_v22, %v1124_v6  ;;  %v941_v30 = vadd.f32 %v939_v12, %v927_v3  ;;  %v926_v32 = vsel %vm920_vm15, %v925_v51, 0.0  ;;  %v3061_v33 = vrot.slane %v2946_v31, %v2918_v21 }
  0x3f   : > { %2516 = vmatpush3.msra.mxu1 %v555_v57  ;;  %2519 = vmatprep.mubr.msk.f32.mxu1 %vm338_vm0, %v2884_v7  ;;  %v938_v34 = vsel %vm932_vm1, %v2941_v29, 0.0  ;;  %v1120_v35 = vsel %vm1114_vm2, %v1118_v62, 0.0  ;;  %v1132_v38 = vsel %vm1126_vm3, %v2958_v36, 0.0  ;;  %vm1113_vm4 = vcmp.eq.s32.totalorder %v2876_v5, %v2987_v52 }
  0x40   : > { %2517 = vmatprep.subr.mxu1 %v554_v0  ;;  %2531 = vmatprep.subr.mxu0 %v748_v1  ;;  %vm1125_vm5 = vcmp.eq.s32.totalorder %v2876_v5, %v1124_v6  ;;  %vm1307_vm6 = vcmp.eq.s32.totalorder %v2921_v22, %v3040_v19  ;;  %vm1319_vm7 = vcmp.eq.s32.totalorder %v2921_v22, %v3061_v33  ;;  %v3097_v41 = vsub.s32 0, %v2876_v5 }
  0x41   : > { %2518 = vmatpush3.msra.mxu1 %v554_v0  ;;  %2507 = vmatmul.mubr.msk.f32.gmra.mxu0 %vm338_vm0, %v3032_v11  ;;  %v3090_v29 = vrot.slane %v2903_v15, %v3001_v58  ;;  %v3094_v40 = vrot.slane %v2946_v31, %v3001_v58  ;;  %v3102_v42 = vsub.f32 %v2890_v9, %v1662_v14  ;;  %v2668_v46 = vcvt.f32.s32 %v2667_v27 }
  0x42   : > { %2520 = vmatmul.mubr.msk.f32.vlgmr.msra.gmra.mxu1 %vm338_vm0, %v2993_v55  ;;  %2509 = vmatprep.mubr.msk.f32.mxu0 %vm338_vm0, %v3045_v24  ;;  %v940_v43 = vadd.f32 %v938_v34, %v926_v32  ;;  %v1134_v44 = vadd.f32 %v1132_v38, %v1120_v35  ;;  %v3106_v45 = vrot.slane %v2892_v10, %v3001_v58  ;;  %v1119_v47 = vsel %vm1113_vm4, %v1118_v62, 0.0 }
  0x43   : > { %2522 = vmatprep.mubr.msk.f32.mxu1 %vm338_vm0, %v3004_v59  ;;  %2532 = vmatpush3.msra.mxu0 %v748_v1  ;;  %v1131_v9 = vsel %vm1125_vm5, %v2958_v36, 0.0  ;;  %v1313_v14 = vsel %vm1307_vm6, %v3050_v25, 0.0  ;;  %v1325_v48 = vsel %vm1319_vm7, %v2962_v37, 0.0  ;;  %vm1500_vm8 = vcmp.eq.s32.totalorder %v2921_v22, %v3054_v26 }
  0x44   : > { %2533 = vmatprep.subr.mxu0 %v747_v28  ;;  %2547 = vmatprep.subr.mxu1 %v941_v30  ;;  %vm1512_vm9 = vcmp.eq.s32.totalorder %v2921_v22, %v3094_v40  ;;  %v1706_v36 = vadd.s32 1, %v2668_v46  ;;  %v1133_v49 = vadd.f32 %v1131_v9, %v1119_v47  ;;  %v1327_v50 = vadd.f32 %v1325_v48, %v1313_v14 }
  0x45   : > { %2510 = vmatmul.mubr.msk.f32.gmra.mxu0 %vm338_vm0, %v3079_v39  ;;  %2548 = vmatpush3.msra.mxu1 %v941_v30  ;;  %v1699_v51 = vsub.f32 1.0, %v3102_v42  ;;  %v1506_v52 = vsel %vm1500_vm8, %v3090_v29, 0.0  ;;  %v1518_v53 = vsel %vm1512_vm9, %v3106_v45, 0.0  ;;  %v3140_v54 = vrot.slane %v2668_v46, %v3097_v41 }
  0x46   : > { %2523 = vmatmul.mubr.msk.f32.gmra.mxu1 %vm338_vm0, %v3032_v11  ;;  %2534 = vmatpush3.msra.mxu0 %v747_v28  ;;  %v3143_v57 = vrot.slane %v1706_v36, %v3097_v41  ;;  %vm1306_vm10 = vcmp.eq.s32.totalorder %v2876_v5, %v3040_v19  ;;  %vm1318_vm11 = vcmp.eq.s32.totalorder %v2876_v5, %v3061_v33  ;;  %vm2784_vm8 = vmmov 0  }
  0x47   : > { %2525 = vmatprep.mubr.msk.f32.mxu1 %vm338_vm0, %v3045_v24  ;;  %2535 = vmatprep.mubr.msk.f32.mxu0 %vm338_vm0, %v2884_v7  ;;  %v1520_v60 = vadd.f32 %v1518_v53, %v1506_v52  ;;  %v1703_v61 = vrot.slane %v1699_v51, %v3097_v41  ;;  %v1716_v62 = vrot.slane %v3102_v42, %v3097_v41  ;;  %v1312_v63 = vsel %vm1306_vm10, %v3050_v25, 0.0 }
  0x48   : > { %2549 = vmatprep.subr.mxu1 %v940_v43  ;;  %2563 = vmatprep.subr.mxu0 %v1134_v44  ;;  %v1324_v0 = vsel %vm1318_vm11, %v2962_v37, 0.0  ;;  %vm1698_vm12 = vcmp.eq.s32.totalorder %v2921_v22, %v3140_v54  ;;  %vm1712_vm13 = vcmp.eq.s32.totalorder %v2921_v22, %v3143_v57  ;;  %vm1499_vm14 = vcmp.eq.s32.totalorder %v2876_v5, %v3054_v26 }
  0x49   : > { %2536 = vmatmul.mubr.msk.f32.vlgmr.msra.gmra.mxu0 %vm338_vm0, %v2993_v55  ;;  %2550 = vmatpush3.msra.mxu1 %v940_v43  ;;  %v1326_v1 = vadd.f32 %v1324_v0, %v1312_v63  ;;  %v1705_v2 = vsel %vm1698_vm12, %v1703_v61, 0.0  ;;  %v1718_v37 = vsel %vm1712_vm13, %v1716_v62, 0.0  ;;  %vm1511_vm15 = vcmp.eq.s32.totalorder %v2876_v5, %v3094_v40 }
  0x4a   : > { %2526 = vmatmul.mubr.msk.f32.gmra.mxu1 %vm338_vm0, %v3079_v39  ;;  %2538 = vmatprep.mubr.msk.f32.mxu0 %vm338_vm0, %v3004_v59  ;;  %v1891_v3 = vrot.slane %v2668_v46, %v2899_v13  ;;  %v1903_v4 = vrot.slane %v1706_v36, %v2899_v13  ;;  %v1720_v6 = vadd.f32 %v1718_v37, %v1705_v2  ;;  %v1505_v12 = vsel %vm1499_vm14, %v3090_v29, 0.0 }
  0x4b   : > { %2528 = vmatprep.mubr.msk.f32.mxu1 %vm338_vm0, %v2887_v8  ;;  %2564 = vmatpush3.msra.mxu0 %v1134_v44  ;;  %v1517_v19 = vsel %vm1511_vm15, %v3106_v45, 0.0  ;;  %v1897_v25 = vrot.slane %v1699_v51, %v2899_v13  ;;  %v1909_v26 = vrot.slane %v3102_v42, %v2899_v13  ;;  %vm1697_vm3 = vcmp.eq.s32.totalorder %v2876_v5, %v3140_v54 }
  0x4c   : > { %2565 = vmatprep.subr.mxu0 %v1133_v49  ;;  %2579 = vmatprep.subr.mxu1 %v1327_v50  ;;  %vm1893_vm1 = vcmp.eq.s32.totalorder %v2921_v22, %v1891_v3  ;;  %vm1905_vm2 = vcmp.eq.s32.totalorder %v2921_v22, %v1903_v4  ;;  %v1519_v27 = vadd.f32 %v1517_v19, %v1505_v12  ;;  %v1704_v33 = vsel %vm1697_vm3, %v1703_v61, 0.0 }
  0x4d   : > { %2539 = vmatmul.mubr.msk.f32.gmra.mxu0 %vm338_vm0, %v3032_v11  ;;  %v1899_v28 = vsel %vm1893_vm1, %v1897_v25, 0.0  ;;  %v1911_v30 = vsel %vm1905_vm2, %v1909_v26, 0.0  ;;  %vm1711_vm4 = vcmp.eq.s32.totalorder %v2876_v5, %v3143_v57  ;;  %vm1892_vm5 = vcmp.eq.s32.totalorder %v2876_v5, %v1891_v3 }
  0x4e   : > { %2529 = vmatmul.mubr.msk.f32.gmra.mxu1 %vm338_vm0, %v2996_v56  ;;  %2541 = vmatprep.mubr.msk.f32.mxu0 %vm338_vm0, %v3045_v24  ;;  %v1913_v32 = vadd.f32 %v1911_v30, %v1899_v28  ;;  %v1717_v34 = vsel %vm1711_vm4, %v1716_v62, 0.0  ;;  %vm1904_vm6 = vcmp.eq.s32.totalorder %v2876_v5, %v1903_v4  ;;  %v1898_v38 = vsel %vm1892_vm5, %v1897_v25, 0.0 }
  0x4f   : > { %2551 = vmatprep.mubr.msk.f32.mxu1 %vm338_vm0, %v2884_v7  ;;  %2566 = vmatpush3.msra.mxu0 %v1133_v49  ;;  %v1719_v35 = vadd.f32 %v1717_v34, %v1704_v33  ;;  %v1910_v29 = vsel %vm1904_vm6, %v1909_v26, 0.0  ;;  %v3699_v45 = vmov 0.0  }
  0x50   : > { %2595 = vmatprep.subr.mxu0 %v1520_v60  ;;  %v1912_v40 = vadd.f32 %v1910_v29, %v1898_v38 }
  0x51   : > { %2542 = vmatmul.mubr.msk.f32.gmra.mxu0 %vm338_vm0, %v3079_v39 }
  0x52   : > { %2552 = vmatmul.mubr.msk.f32.vlgmr.msra.gmra.mxu1 %vm338_vm0, %v2993_v55  ;;  %2544 = vmatprep.mubr.msk.f32.mxu0 %vm338_vm0, %v2887_v8 }
  0x53   : > { %2554 = vmatprep.mubr.msk.f32.mxu1 %vm338_vm0, %v3004_v59  ;;  %2580 = vmatpush3.msra.mxu1 %v1327_v50 }
  0x54   : > { %2581 = vmatprep.subr.mxu1 %v1326_v1 }
  0x55   : > { %2545 = vmatmul.mubr.msk.f32.gmra.mxu0 %vm338_vm0, %v2996_v56  ;;  %2582 = vmatpush3.msra.mxu1 %v1326_v1 }
  0x56   : > { %2555 = vmatmul.mubr.msk.f32.gmra.mxu1 %vm338_vm0, %v3032_v11  ;;  %2567 = vmatprep.mubr.msk.f32.mxu0 %vm338_vm0, %v2884_v7 }
  0x57   : > { %2557 = vmatprep.mubr.msk.f32.mxu1 %vm338_vm0, %v3045_v24  ;;  %2611 = vmatprep.subr.mxu1 %v1720_v6 }
  0x59   : > { %2568 = vmatmul.mubr.msk.f32.vlgmr.msra.gmra.mxu0 %vm338_vm0, %v2993_v55 }
  0x5a   : > { %2558 = vmatmul.mubr.msk.f32.gmra.mxu1 %vm338_vm0, %v3079_v39  ;;  %2570 = vmatprep.mubr.msk.f32.mxu0 %vm338_vm0, %v3004_v59 }
  0x5b   : > { %2560 = vmatprep.mubr.msk.f32.mxu1 %vm338_vm0, %v2887_v8  ;;  %2596 = vmatpush3.msra.mxu0 %v1520_v60 }
  0x5c   : > { %2597 = vmatprep.subr.mxu0 %v1519_v27 }
  0x5d   : > { %2571 = vmatmul.mubr.msk.f32.gmra.mxu0 %vm338_vm0, %v3032_v11 }
  0x5e   : > { %2561 = vmatmul.mubr.msk.f32.gmra.mxu1 %vm338_vm0, %v2996_v56  ;;  %2573 = vmatprep.mubr.msk.f32.mxu0 %vm338_vm0, %v3045_v24 }
  0x5f   : > { %2583 = vmatprep.mubr.msk.f32.mxu1 %vm338_vm0, %v2884_v7  ;;  %2598 = vmatpush3.msra.mxu0 %v1519_v27 }
  0x60   : > { %2627 = vmatprep.subr.mxu0 %v1913_v32 }
  0x61   : > { %2574 = vmatmul.mubr.msk.f32.gmra.mxu0 %vm338_vm0, %v3079_v39 }
  0x62   : > { %2584 = vmatmul.mubr.msk.f32.vlgmr.msra.gmra.mxu1 %vm338_vm0, %v2993_v55  ;;  %2576 = vmatprep.mubr.msk.f32.mxu0 %vm338_vm0, %v2887_v8 }
  0x63   : > { %2586 = vmatprep.mubr.msk.f32.mxu1 %vm338_vm0, %v3004_v59  ;;  %2612 = vmatpush3.msra.mxu1 %v1720_v6 }
  0x64   : > { %2613 = vmatprep.subr.mxu1 %v1719_v35 }
  0x65   : > { %2577 = vmatmul.mubr.msk.f32.gmra.mxu0 %vm338_vm0, %v2996_v56  ;;  %2614 = vmatpush3.msra.mxu1 %v1719_v35 }
  0x66   : > { %2587 = vmatmul.mubr.msk.f32.gmra.mxu1 %vm338_vm0, %v3032_v11  ;;  %2599 = vmatprep.mubr.msk.f32.mxu0 %vm338_vm0, %v2884_v7 }
  0x67   : > { %2589 = vmatprep.mubr.msk.f32.mxu1 %vm338_vm0, %v3045_v24  ;;  %2643 = vmatprep.subr.mxu1 %v3699_v45 }
  0x69   : > { %2600 = vmatmul.mubr.msk.f32.vlgmr.msra.gmra.mxu0 %vm338_vm0, %v2993_v55 }
  0x6a   : > { %2590 = vmatmul.mubr.msk.f32.gmra.mxu1 %vm338_vm0, %v3079_v39  ;;  %2602 = vmatprep.mubr.msk.f32.mxu0 %vm338_vm0, %v3004_v59 }
  0x6b   : > { %2592 = vmatprep.mubr.msk.f32.mxu1 %vm338_vm0, %v2887_v8  ;;  %2628 = vmatpush3.msra.mxu0 %v1913_v32 }
  0x6c   : > { %2629 = vmatprep.subr.mxu0 %v1912_v40 }
  0x6d   : > { %2603 = vmatmul.mubr.msk.f32.gmra.mxu0 %vm338_vm0, %v3032_v11 }
  0x6e   : > { %2593 = vmatmul.mubr.msk.f32.gmra.mxu1 %vm338_vm0, %v2996_v56  ;;  %2605 = vmatprep.mubr.msk.f32.mxu0 %vm338_vm0, %v3045_v24 }
  0x6f   : > { %2615 = vmatprep.mubr.msk.f32.mxu1 %vm338_vm0, %v2884_v7  ;;  %2630 = vmatpush3.msra.mxu0 %v1912_v40 }
  0x71   : > { %2606 = vmatmul.mubr.msk.f32.gmra.mxu0 %vm338_vm0, %v3079_v39 }
  0x72   : > { %2616 = vmatmul.mubr.msk.f32.vlgmr.msra.gmra.mxu1 %vm338_vm0, %v2993_v55  ;;  %2608 = vmatprep.mubr.msk.f32.mxu0 %vm338_vm0, %v2887_v8 }
  0x73   : > { %2618 = vmatprep.mubr.msk.f32.mxu1 %vm338_vm0, %v3004_v59 }
  0x75   : > { %2609 = vmatmul.mubr.msk.f32.gmra.mxu0 %vm338_vm0, %v2996_v56 }
  0x76   : > { %2619 = vmatmul.mubr.msk.f32.gmra.mxu1 %vm338_vm0, %v3032_v11  ;;  %2631 = vmatprep.mubr.msk.f32.mxu0 %vm338_vm0, %v2884_v7  ;;  %v266_v7 = vld [vmem:[%s2872_s10] sm:$0xff] }
  0x77   : > { %2621 = vmatprep.mubr.msk.f32.mxu1 %vm338_vm0, %v3045_v24 }
  0x79   : > { %2632 = vmatmul.mubr.msk.f32.vlgmr.msra.gmra.mxu0 %vm338_vm0, %v2993_v55  ;;  %v272_v55 = vfloor.f32 %v266_v7 }
  0x7a   : > { %2622 = vmatmul.mubr.msk.f32.gmra.mxu1 %vm338_vm0, %v3079_v39  ;;  %2634 = vmatprep.mubr.msk.f32.mxu0 %vm338_vm0, %v3004_v59 }
  0x7b   : > { %2624 = vmatprep.mubr.msk.f32.mxu1 %vm338_vm0, %v2887_v8  ;;  %v276_v59 = vmax.f32 %v272_v55, -2.0  ;;  %v3294_v44 = vsub.f32 %v266_v7, %v272_v55 }
  0x7d   : > { %2635 = vmatmul.mubr.msk.f32.gmra.mxu0 %vm338_vm0, %v3032_v11  ;;  %v277_v42 = vmin.f32 %v276_v59, 16.0  ;;  %v305_v47 = vrot.slane %v3294_v44, %v3097_v41  ;;  %v525_v53 = vrot.slane %v3294_v44, %v2899_v13  ;;  %v911_v62 = vrot.slane %v3294_v44, %v2909_v17 }
  0x7e   : > { %2625 = vmatmul.mubr.msk.f32.gmra.mxu1 %vm338_vm0, %v2996_v56  ;;  %2637 = vmatprep.mubr.msk.f32.mxu0 %vm338_vm0, %v3045_v24  ;;  %v1104_v55 = vrot.slane %v3294_v44, %v2912_v18 }
  0x7f   : > { %v2663_v11 = vtrunc.f32 %v277_v42  ;;  %2653 = vmatprep.mubr.msk.f32.mxu1 %vm2784_vm8, %v3699_v45 }
  0x81   : > { %2638 = vmatmul.mubr.msk.f32.gmra.mxu0 %vm338_vm0, %v3079_v39  ;;  %v3292_v43 = vcvt.f32.s32 %v2663_v11 }
  0x82   : > { %2640 = vmatprep.mubr.msk.f32.mxu0 %vm338_vm0, %v2887_v8  ;;  %v3301_v8 = vsub.f32 1.0, %v3294_v44 }
  0x83   : > { %v3297_v24 = vadd.s32 1, %v3292_v43  ;;  %v507_v48 = vrot.slane %v3292_v43, %v2899_v13  ;;  %v700_v49 = vrot.slane %v3292_v43, %v2906_v16  ;;  %v893_v54 = vrot.slane %v3292_v43, %v2909_v17 }
  0x84   : > { %v292_v46 = vrot.slane %v3301_v8, %v3097_v41  ;;  %v513_v52 = vrot.slane %v3301_v8, %v2899_v13  ;;  %v706_v60 = vrot.slane %v3301_v8, %v2906_v16  ;;  %v899_v61 = vrot.slane %v3301_v8, %v2909_v17 }
  0x85   : > { %2641 = vmatmul.mubr.msk.f32.gmra.mxu0 %vm338_vm0, %v2996_v56  ;;  %v285_v56 = vrot.slane %v3292_v43, %v3097_v41  ;;  %v299_v39 = vrot.slane %v3297_v24, %v3097_v41  ;;  %v519_v36 = vrot.slane %v3297_v24, %v2899_v13  ;;  %v712_v50 = vrot.slane %v3297_v24, %v2906_v16 }
  0x86   : > { %v905_v57 = vrot.slane %v3297_v24, %v2909_v17  ;;  %vm509_vm11 = vcmp.eq.s32.totalorder %v2921_v22, %v507_v48  ;;  %vm508_vm13 = vcmp.eq.s32.totalorder %v2876_v5, %v507_v48  ;;  %vm702_vm15 = vcmp.eq.s32.totalorder %v2921_v22, %v700_v49 }
  0x87   : > { %vm287_vm0 = vcmp.eq.s32.totalorder %v2921_v22, %v285_v56  ;;  %vm301_vm7 = vcmp.eq.s32.totalorder %v2921_v22, %v299_v39  ;;  %vm286_vm9 = vcmp.eq.s32.totalorder %v2876_v5, %v285_v56  ;;  %vm300_vm10 = vcmp.eq.s32.totalorder %v2876_v5, %v299_v39 }
  0x88   : > { %v294_v9 = vsel %vm287_vm0, %v292_v46, 0.0  ;;  %v307_v14 = vsel %vm301_vm7, %v305_v47, 0.0  ;;  %vm521_vm12 = vcmp.eq.s32.totalorder %v2921_v22, %v519_v36  ;;  %vm520_vm14 = vcmp.eq.s32.totalorder %v2876_v5, %v519_v36 }
  0x89   : > { %v3322_v51 = vadd.f32 %v307_v14, %v294_v9  ;;  %vm714_vm1 = vcmp.eq.s32.totalorder %v2921_v22, %v712_v50  ;;  %v718_v13 = vrot.slane %v3294_v44, %v2906_v16  ;;  %vm701_vm2 = vcmp.eq.s32.totalorder %v2876_v5, %v700_v49 }
  0x8a   : > { %vm713_vm3 = vcmp.eq.s32.totalorder %v2876_v5, %v712_v50  ;;  %v293_v63 = vsel %vm286_vm9, %v292_v46, 0.0  ;;  %v306_v0 = vsel %vm300_vm10, %v305_v47, 0.0  ;;  %vm895_vm4 = vcmp.eq.s32.totalorder %v2921_v22, %v893_v54 }
  0x8b   : > { %vm907_vm5 = vcmp.eq.s32.totalorder %v2921_v22, %v905_v57  ;;  %v515_v16 = vsel %vm509_vm11, %v513_v52, 0.0  ;;  %v527_v1 = vsel %vm521_vm12, %v525_v53, 0.0  ;;  %v514_v2 = vsel %vm508_vm13, %v513_v52, 0.0 }
  0x8c   : > { %v526_v17 = vsel %vm520_vm14, %v525_v53, 0.0  ;;  %v708_v37 = vsel %vm702_vm15, %v706_v60, 0.0  ;;  %v720_v3 = vsel %vm714_vm1, %v718_v13, 0.0  ;;  %v707_v4 = vsel %vm701_vm2, %v706_v60, 0.0 }
  0x8d   : > { %v719_v6 = vsel %vm713_vm3, %v718_v13, 0.0  ;;  %v901_v12 = vsel %vm895_vm4, %v899_v61, 0.0  ;;  %v913_v19 = vsel %vm907_vm5, %v911_v62, 0.0  ;;  %vm894_vm6 = vcmp.eq.s32.totalorder %v2876_v5, %v893_v54 }
  0x8e   : > { %vm906_vm0 = vcmp.eq.s32.totalorder %v2876_v5, %v905_v57  ;;  %v3368_v25 = vadd.f32 %v306_v0, %v293_v63  ;;  %v3370_v26 = vadd.f32 %v527_v1, %v515_v16  ;;  %v1086_v27 = vrot.slane %v3292_v43, %v2912_v18 }
  0x8f   : > { %v1098_v28 = vrot.slane %v3297_v24, %v2912_v18  ;;  %v3376_v30 = vadd.f32 %v526_v17, %v514_v2  ;;  %v3378_v32 = vadd.f32 %v720_v3, %v708_v37  ;;  %v1279_v33 = vrot.slane %v3292_v43, %v2915_v20 }
  0x90   : > { %v1291_v34 = vrot.slane %v3297_v24, %v2915_v20  ;;  %v3384_v35 = vadd.f32 %v719_v6, %v707_v4  ;;  %v3386_v38 = vadd.f32 %v913_v19, %v901_v12  ;;  %v900_v29 = vsel %vm894_vm6, %v899_v61, 0.0 }
  0x91   : > { %v912_v40 = vsel %vm906_vm0, %v911_v62, 0.0  ;;  %v1092_v7 = vrot.slane %v3301_v8, %v2912_v18  ;;  %v1472_v59 = vrot.slane %v3292_v43, %v2918_v21  ;;  %v1484_v42 = vrot.slane %v3297_v24, %v2918_v21 }
  0x92   : > { %vm1088_vm7 = vcmp.eq.s32.totalorder %v2921_v22, %v1086_v27  ;;  %vm1100_vm8 = vcmp.eq.s32.totalorder %v2921_v22, %v1098_v28  ;;  %vm1087_vm9 = vcmp.eq.s32.totalorder %v2876_v5, %v1086_v27  ;;  %vm1099_vm10 = vcmp.eq.s32.totalorder %v2876_v5, %v1098_v28 }
  0x93   : > { %vm1281_vm11 = vcmp.eq.s32.totalorder %v2921_v22, %v1279_v33  ;;  %v1285_v11 = vrot.slane %v3301_v8, %v2915_v20  ;;  %vm1293_vm12 = vcmp.eq.s32.totalorder %v2921_v22, %v1291_v34  ;;  %v1297_v18 = vrot.slane %v3294_v44, %v2915_v20 }
  0x94   : > { %vm1280_vm13 = vcmp.eq.s32.totalorder %v2876_v5, %v1279_v33  ;;  %vm1292_vm14 = vcmp.eq.s32.totalorder %v2876_v5, %v1291_v34  ;;  %v1478_v56 = vrot.slane %v3301_v8, %v2918_v21  ;;  %v1490_v39 = vrot.slane %v3294_v44, %v2918_v21 }
  0x95   : > { %v1094_v46 = vsel %vm1088_vm7, %v1092_v7, 0.0  ;;  %v1106_v47 = vsel %vm1100_vm8, %v1104_v55, 0.0  ;;  %vm1474_vm15 = vcmp.eq.s32.totalorder %v2921_v22, %v1472_v59  ;;  %vm1486_vm1 = vcmp.eq.s32.totalorder %v2921_v22, %v1484_v42 }
  0x96   : > { %v1093_v9 = vsel %vm1087_vm9, %v1092_v7, 0.0  ;;  %v1105_v14 = vsel %vm1099_vm10, %v1104_v55, 0.0  ;;  %vm1473_vm2 = vcmp.eq.s32.totalorder %v2876_v5, %v1472_v59  ;;  %vm1485_vm3 = vcmp.eq.s32.totalorder %v2876_v5, %v1484_v42 }
  0x97   : > { %v1287_v36 = vsel %vm1281_vm11, %v1285_v11, 0.0  ;;  %v1299_v21 = vsel %vm1293_vm12, %v1297_v18, 0.0  ;;  %v1286_v49 = vsel %vm1280_vm13, %v1285_v11, 0.0  ;;  %v1298_v50 = vsel %vm1292_vm14, %v1297_v18, 0.0 }
  0x98   : > { %v1480_v54 = vsel %vm1474_vm15, %v1478_v56, 0.0  ;;  %v1492_v57 = vsel %vm1486_vm1, %v1490_v39, 0.0  ;;  %v3426_v61 = vadd.f32 %v912_v40, %v900_v29  ;;  %v1479_v62 = vsel %vm1473_vm2, %v1478_v56, 0.0 }
  0x99   : > { %v1491_v63 = vsel %vm1485_vm3, %v1490_v39, 0.0  ;;  %v1670_v0 = vrot.slane %v3292_v43, %v3001_v58  ;;  %v3432_v2 = vadd.f32 %v1106_v47, %v1094_v46  ;;  %v1682_v17 = vrot.slane %v3297_v24, %v3001_v58 }
  0x9a   : > { %v3436_v3 = vadd.f32 %v1105_v14, %v1093_v9  ;;  %v3438_v4 = vadd.f32 %v1299_v21, %v1287_v36  ;;  %v3440_v6 = vadd.f32 %v1298_v50, %v1286_v49  ;;  %v3442_v12 = vadd.f32 %v1492_v57, %v1480_v54 }
  0x9b   : > { %v3445_v33 = vadd.f32 %v1491_v63, %v1479_v62  ;;  %vm1672_vm4 = vcmp.eq.s32.totalorder %v2921_v22, %v1670_v0  ;;  %v1676_v24 = vrot.slane %v3301_v8, %v3001_v58  ;;  %v1688_v40 = vrot.slane %v3294_v44, %v3001_v58 }
  0x9c   : > { %vm1684_vm5 = vcmp.eq.s32.totalorder %v2921_v22, %v1682_v17  ;;  %vm1671_vm6 = vcmp.eq.s32.totalorder %v2876_v5, %v1670_v0  ;;  %vm1683_vm0 = vcmp.eq.s32.totalorder %v2876_v5, %v1682_v17  ;;  %v1865_v8 = vrot.slane %v2923_v23, %v3097_v41 }
  0x9d   : > { %v1877_v46 = vrot.slane %v2946_v31, %v3097_v41  ;;  %v1689_v21 = vsel %vm1683_vm0, %v1688_v40, 0.0  ;;  %v1871_v31 = vrot.slane %v2903_v15, %v3097_v41  ;;  %vm2059_vm11 = vcmask 1041409  }
  0x9e   : > { %vm1867_vm7 = vcmp.eq.s32.totalorder %v2921_v22, %v1865_v8  ;;  %vm1866_vm9 = vcmp.eq.s32.totalorder %v2876_v5, %v1865_v8  ;;  %vm2061_vm12 = vcmask 1042434   ;;  %vm2070_vm13 = vcmask 1045509  }
  0x9f   : > { %vm1879_vm8 = vcmp.eq.s32.totalorder %v2921_v22, %v1877_v46  ;;  %vm1878_vm10 = vcmp.eq.s32.totalorder %v2876_v5, %v1877_v46  ;;  %vm2063_vm14 = vcmask 1043459   ;;  %vm2072_vm15 = vcmask 1046534  }
  0xa0   : > { %vm2074_vm1 = vcmask 1047559   ;;  %vm2132_vm2 = vcmask 1043456   ;;  %vm2138_vm3 = vcmask 293888  }
  0xfd   : > { %v2505_v20 = vpop.f32.mrf.mxu0  ;;  %v2514_v48 = vpop.f32.mrf.mxu1 }
  0xfe   : > { %v469_v52 = vmul.f32 %v2505_v20, %v3322_v51  ;;  %v475_v53 = vmul.f32 %v2514_v48, %v3322_v51  ;;  %v1678_v20 = vsel %vm1672_vm4, %v1676_v24, 0.0  ;;  %v1690_v48 = vsel %vm1684_vm5, %v1688_v40, 0.0 }
  0xff   : > { %v429_v60 = vpop.f32.mrf.mxu0  ;;  %v459_v13 = vpop.f32.mrf.mxu1  ;;  %v3480_v17 = vadd.f32 %v1690_v48, %v1678_v20 }
 0x100   : > { %v468_v16 = vmul.f32 %v429_v60, %v3368_v25  ;;  %v474_v1 = vmul.f32 %v459_v13, %v3368_v25 }
 0x101   : > { %v2508_v37 = vpop.f32.mrf.mxu0 }
 0x102   : > { %v476_v19 = vadd.f32 %v469_v52, %v468_v16  ;;  %v497_v43 = vadd.f32 %v475_v53, %v474_v1  ;;  %v471_v27 = vmul.f32 %v2508_v37, %v3322_v51  ;;  %v2521_v28 = vpop.f32.mrf.mxu1  ;;  %v1883_v53 = vrot.slane %v2892_v10, %v3097_v41 }
 0x103   : > { %v662_v34 = vmul.f32 %v2521_v28, %v3370_v26  ;;  %v439_v29 = vpop.f32.mrf.mxu0 }
 0x104   : > { %v477_v7 = vrot.slane %v476_v19, 4  ;;  %v470_v55 = vmul.f32 %v439_v29, %v3368_v25  ;;  %v622_v59 = vpop.f32.mrf.mxu1  ;;  %v498_v42 = vrot.slane %v497_v43, 4  ;;  %v1873_v29 = vsel %vm1867_vm7, %v1871_v31, 0.0 }
 0x105   : > { %v661_v11 = vmul.f32 %v622_v59, %v3376_v30  ;;  %v2511_v18 = vpop.f32.mrf.mxu0 }
 0x106   : > { %v478_v56 = vadd.f32 %v477_v7, %v476_v19  ;;  %v483_v39 = vadd.f32 %v471_v27, %v470_v55  ;;  %v473_v58 = vmul.f32 %v2511_v18, %v3322_v51  ;;  %v2524_v44 = vpop.f32.mrf.mxu1  ;;  %v1677_v51 = vsel %vm1671_vm6, %v1676_v24, 0.0 }
 0x107   : > { %v669_v47 = vadd.f32 %v662_v34, %v661_v11  ;;  %v664_v9 = vmul.f32 %v2524_v44, %v3370_v26  ;;  %v449_v14 = vpop.f32.mrf.mxu0  ;;  %v499_v49 = vadd.f32 %v498_v42, %v497_v43  ;;  %v3486_v34 = vadd.f32 %v1689_v21, %v1677_v51 }
 0x108   : > { %v472_v23 = vmul.f32 %v449_v14, %v3368_v25  ;;  %v632_v36 = vpop.f32.mrf.mxu1  ;;  %v479_v54 = vrot.slane %v478_v56, 2  ;;  %v484_v57 = vrot.slane %v483_v39, 4  ;;  %v1885_v24 = vsel %vm1879_vm8, %v1883_v53, 0.0 }
 0x109   : > { %v663_v50 = vmul.f32 %v632_v36, %v3376_v30  ;;  %v2537_v52 = vpop.f32.mrf.mxu0  ;;  %v670_v13 = vrot.slane %v669_v47, 4  ;;  %v500_v10 = vrot.slane %v499_v49, 2  ;;  %v1884_v44 = vsel %vm1878_vm10, %v1883_v53, 0.0 }
 0x10a   : > { %v490_v25 = vadd.f32 %v473_v58, %v472_v23  ;;  %v2527_v60 = vpop.f32.mrf.mxu1  ;;  %v855_v15 = vmul.f32 %v2537_v52, %v3378_v32  ;;  %v480_v27 = vadd.f32 %v479_v54, %v478_v56  ;;  %v485_v40 = vadd.f32 %v484_v57, %v483_v39 }
 0x10b   : > { %v676_v62 = vadd.f32 %v664_v9, %v663_v50  ;;  %v666_v63 = vmul.f32 %v2527_v60, %v3370_v26  ;;  %v815_v0 = vpop.f32.mrf.mxu0  ;;  %v671_v7 = vadd.f32 %v670_v13, %v669_v47  ;;  %v1872_v56 = vsel %vm1866_vm9, %v1871_v31, 0.0 }
 0x10c   : > { %v491_v16 = vrot.slane %v490_v25, 4  ;;  %v642_v1 = vpop.f32.mrf.mxu1  ;;  %v854_v19 = vmul.f32 %v815_v0, %v3384_v35  ;;  %v501_v9 = vadd.f32 %v500_v10, %v499_v49  ;;  %v481_v51 = vrot.slane %v480_v27, 1 }
 0x10d   : > { %v677_v41 = vrot.slane %v676_v62, 4  ;;  %v665_v37 = vmul.f32 %v642_v1, %v3376_v30  ;;  %v2540_v43 = vpop.f32.mrf.mxu0  ;;  %v486_v8 = vrot.slane %v485_v40, 2  ;;  %v672_v21 = vrot.slane %v671_v7, 2 }
 0x10e   : > { %v2530_v28 = vpop.f32.mrf.mxu1  ;;  %v862_v59 = vadd.f32 %v855_v15, %v854_v19  ;;  %v492_v11 = vadd.f32 %v491_v16, %v490_v25  ;;  %v857_v39 = vmul.f32 %v2540_v43, %v3378_v32  ;;  %v3502_v5 = vadd.f32 %v1884_v44, %v1872_v56 }
 0x10f   : > { %v683_v55 = vadd.f32 %v666_v63, %v665_v37  ;;  %v825_v42 = vpop.f32.mrf.mxu0  ;;  %v668_v18 = vmul.f32 %v2530_v28, %v3370_v26  ;;  %v678_v14 = vadd.f32 %v677_v41, %v676_v62  ;;  %v3500_v26 = vadd.f32 %v1885_v24, %v1873_v29 }
 0x110   : > { %v652_v58 = vpop.f32.mrf.mxu1  ;;  %v863_v22 = vrot.slane %v862_v59, 4  ;;  %v856_v23 = vmul.f32 %v825_v42, %v3384_v35  ;;  %v493_v46 = vrot.slane %v492_v11, 2  ;;  %v502_v54 = vrot.slane %v501_v9, 1 }
 0x111   : > { %v684_v20 = vrot.slane %v683_v55, 4  ;;  %v2543_v48 = vpop.f32.mrf.mxu0  ;;  %v667_v47 = vmul.f32 %v652_v58, %v3376_v30  ;;  %v679_v57 = vrot.slane %v678_v14, 2  ;;  %v3507_v16 = vadd.f32 %v481_v51, %v480_v27 }
 0x112   : > { %v2553_v36 = vpop.f32.mrf.mxu1  ;;  %v869_v52 = vadd.f32 %v857_v39, %v856_v23  ;;  %v864_v25 = vadd.f32 %v863_v22, %v862_v59  ;;  %v859_v63 = vmul.f32 %v2543_v48, %v3378_v32  ;;  %v487_v1 = vadd.f32 %v486_v8, %v485_v40 }
 0x113   : > { %v835_v31 = vpop.f32.mrf.mxu0  ;;  %v685_v49 = vadd.f32 %v684_v20, %v683_v55  ;;  %v690_v50 = vadd.f32 %v668_v18, %v667_v47  ;;  %v1048_v30 = vmul.f32 %v2553_v36, %v3386_v38  ;;  %v673_v10 = vadd.f32 %v672_v21, %v671_v7 }
 0x114   : > { %v1008_v53 = vpop.f32.mrf.mxu1  ;;  %v870_v62 = vrot.slane %v869_v52, 4  ;;  %v858_v15 = vmul.f32 %v835_v31, %v3384_v35  ;;  %v494_v19 = vadd.f32 %v493_v46, %v492_v11  ;;  %v680_v55 = vadd.f32 %v679_v57, %v678_v14 }
 0x115   : > { %v2546_v60 = vpop.f32.mrf.mxu0  ;;  %v691_v13 = vrot.slane %v690_v50, 4  ;;  %v1047_v41 = vmul.f32 %v1008_v53, %v3426_v61  ;;  %v686_v43 = vrot.slane %v685_v49, 2  ;;  %v865_v59 = vrot.slane %v864_v25, 2 }
 0x116   : > { %v2556_v0 = vpop.f32.mrf.mxu1  ;;  %v876_v29 = vadd.f32 %v859_v63, %v858_v15  ;;  %v871_v56 = vadd.f32 %v870_v62, %v869_v52  ;;  %v861_v27 = vmul.f32 %v2546_v60, %v3378_v32  ;;  %v3513_v20 = vadd.f32 %v502_v54, %v501_v9 }
 0x117   : > { %v845_v37 = vpop.f32.mrf.mxu0  ;;  %v692_v28 = vadd.f32 %v691_v13, %v690_v50  ;;  %v1055_v42 = vadd.f32 %v1048_v30, %v1047_v41  ;;  %v1050_v18 = vmul.f32 %v2556_v0, %v3386_v38  ;;  %v488_v11 = vrot.slane %v487_v1, 1 }
 0x118   : > { %v1018_v24 = vpop.f32.mrf.mxu1  ;;  %v877_v44 = vrot.slane %v876_v29, 4  ;;  %v860_v40 = vmul.f32 %v845_v37, %v3384_v35  ;;  %v674_v22 = vrot.slane %v673_v10, 1  ;;  %v495_v14 = vrot.slane %v494_v19, 1 }
 0x119   : > { %v2569_v58 = vpop.f32.mrf.mxu0  ;;  %v1049_v48 = vmul.f32 %v1018_v24, %v3426_v61  ;;  %v687_v47 = vadd.f32 %v686_v43, %v685_v49  ;;  %v693_v23 = vrot.slane %v692_v28, 2  ;;  %v1056_v21 = vrot.slane %v1055_v42, 4 }
 0x11a   : > { %v2559_v7 = vpop.f32.mrf.mxu1  ;;  %v883_v36 = vadd.f32 %v861_v27, %v860_v40  ;;  %v878_v8 = vadd.f32 %v877_v44, %v876_v29  ;;  %v681_v35 = vrot.slane %v680_v55, 1  ;;  %v866_v50 = vadd.f32 %v865_v59, %v864_v25 }
 0x11b   : > { %v1201_v39 = vpop.f32.mrf.mxu0  ;;  %v1062_v31 = vadd.f32 %v1050_v18, %v1049_v48  ;;  %v1052_v32 = vmul.f32 %v2559_v7, %v3386_v38  ;;  %v872_v9 = vrot.slane %v871_v56, 2  ;;  %v1241_v57 = vmul.f32 %v2569_v58, %v3432_v2 }
 0x11c   : > { %v1028_v51 = vpop.f32.mrf.mxu1  ;;  %v884_v52 = vrot.slane %v883_v36, 4  ;;  %v1240_v49 = vmul.f32 %v1201_v39, %v3436_v3  ;;  %v3520_v13 = vadd.f32 %v488_v11, %v487_v1  ;;  %v3522_v62 = vadd.f32 %v674_v22, %v673_v10 }
 0x11d   : > { %v2572_v46 = vpop.f32.mrf.mxu0  ;;  %v1063_v54 = vrot.slane %v1062_v31, 4  ;;  %v1051_v30 = vmul.f32 %v1028_v51, %v3426_v61  ;;  %v688_v63 = vrot.slane %v687_v47, 1  ;;  %v694_v15 = vadd.f32 %v693_v23, %v692_v28 }
 0x11e   : > { %v2562_v53 = vpop.f32.mrf.mxu1  ;;  %v879_v41 = vrot.slane %v878_v8, 2  ;;  %v1057_v25 = vadd.f32 %v1056_v21, %v1055_v42  ;;  %v1248_v43 = vadd.f32 %v1241_v57, %v1240_v49  ;;  %v3524_v24 = vadd.f32 %v495_v14, %v494_v19 }
 0x11f   : > { %v1211_v60 = vpop.f32.mrf.mxu0  ;;  %v1069_v37 = vadd.f32 %v1052_v32, %v1051_v30  ;;  %v867_v59 = vrot.slane %v866_v50, 1  ;;  %v885_v18 = vadd.f32 %v884_v52, %v883_v36  ;;  %v1054_v58 = vmul.f32 %v2562_v53, %v3386_v38 }
 0x120   : > { %v1038_v0 = vpop.f32.mrf.mxu1  ;;  %v3527_v27 = vadd.f32 %v681_v35, %v680_v55  ;;  %v873_v1 = vadd.f32 %v872_v9, %v871_v56  ;;  %v1064_v10 = vadd.f32 %v1063_v54, %v1062_v31  ;;  %v1249_v28 = vrot.slane %v1248_v43, 4 }
 0x121   : > { %v2575_v29 = vpop.f32.mrf.mxu0  ;;  %v1070_v40 = vrot.slane %v1069_v37, 4  ;;  %v1243_v11 = vmul.f32 %v2572_v46, %v3432_v2  ;;  %v1053_v42 = vmul.f32 %v1038_v0, %v3426_v61  ;;  %v1242_v22 = vmul.f32 %v1211_v60, %v3436_v3 }
 0x122   : > { %v2585_v44 = vpop.f32.mrf.mxu1  ;;  %v3532_v48 = vadd.f32 %v688_v63, %v687_v47  ;;  %v695_v39 = vrot.slane %v694_v15, 1  ;;  %v880_v14 = vadd.f32 %v879_v41, %v878_v8  ;;  %v1058_v38 = vrot.slane %v1057_v25, 2 }
 0x123   : > { %v1221_v7 = vpop.f32.mrf.mxu0  ;;  %v3534_v55 = vadd.f32 %v867_v59, %v866_v50  ;;  %v886_v56 = vrot.slane %v885_v18, 2  ;;  %v1076_v36 = vadd.f32 %v1054_v58, %v1053_v42  ;;  %v1255_v51 = vadd.f32 %v1243_v11, %v1242_v22 }
 0x124   : > { %v1394_v19 = vpop.f32.mrf.mxu1  ;;  %v874_v31 = vrot.slane %v873_v1, 1  ;;  %v1065_v32 = vrot.slane %v1064_v10, 2  ;;  %v1071_v46 = vadd.f32 %v1070_v40, %v1069_v37  ;;  %v1434_v61 = vmul.f32 %v2585_v44, %v3438_v4 }
 0x125   : > { %v2578_v23 = vpop.f32.mrf.mxu0  ;;  %v1250_v9 = vadd.f32 %v1249_v28, %v1248_v43  ;;  %v1077_v52 = vrot.slane %v1076_v36, 4  ;;  %v1245_v47 = vmul.f32 %v2575_v29, %v3432_v2  ;;  %v1244_v8 = vmul.f32 %v1221_v7, %v3436_v3 }
 0x126   : > { %v2588_v21 = vpop.f32.mrf.mxu1  ;;  %v3539_v54 = vadd.f32 %v695_v39, %v694_v15  ;;  %v881_v50 = vrot.slane %v880_v14, 1  ;;  %v1059_v57 = vadd.f32 %v1058_v38, %v1057_v25  ;;  %v1433_v30 = vmul.f32 %v1394_v19, %v3440_v6 }
 0x127   : > { %v1231_v35 = vpop.f32.mrf.mxu0  ;;  %v887_v60 = vadd.f32 %v886_v56, %v885_v18  ;;  %v1078_v63 = vadd.f32 %v1077_v52, %v1076_v36  ;;  %v1256_v0 = vrot.slane %v1255_v51, 4  ;;  %v1262_v41 = vadd.f32 %v1245_v47, %v1244_v8 }
 0x128   : > { %v1404_v53 = vpop.f32.mrf.mxu1  ;;  %v1066_v59 = vadd.f32 %v1065_v32, %v1064_v10  ;;  %v1072_v43 = vrot.slane %v1071_v46, 2  ;;  %v1441_v58 = vadd.f32 %v1434_v61, %v1433_v30  ;;  %v1436_v29 = vmul.f32 %v2588_v21, %v3438_v4 }
 0x129   : > { %v2601_v49 = vpop.f32.mrf.mxu0  ;;  %v1251_v40 = vrot.slane %v1250_v9, 2  ;;  %v1263_v7 = vrot.slane %v1262_v41, 4  ;;  %v1247_v15 = vmul.f32 %v2578_v23, %v3432_v2  ;;  %v1246_v25 = vmul.f32 %v1231_v35, %v3436_v3 }
 0x12a   : > { %v2591_v37 = vpop.f32.mrf.mxu1  ;;  %v3545_v11 = vadd.f32 %v874_v31, %v873_v1  ;;  %v3547_v18 = vadd.f32 %v881_v50, %v880_v14  ;;  %v1060_v42 = vrot.slane %v1059_v57, 1  ;;  %v1435_v22 = vmul.f32 %v1404_v53, %v3440_v6 }
 0x12b   : > { %v1587_v44 = vpop.f32.mrf.mxu0  ;;  %v888_v19 = vrot.slane %v887_v60, 1  ;;  %v1079_v39 = vrot.slane %v1078_v63, 2  ;;  %v1257_v38 = vadd.f32 %v1256_v0, %v1255_v51  ;;  %v1269_v56 = vadd.f32 %v1247_v15, %v1246_v25 }
 0x12c   : > { %v1414_v28 = vpop.f32.mrf.mxu1  ;;  %v1264_v21 = vadd.f32 %v1263_v7, %v1262_v41  ;;  %v1442_v32 = vrot.slane %v1441_v58, 4  ;;  %v1448_v61 = vadd.f32 %v1436_v29, %v1435_v22  ;;  %v1438_v2 = vmul.f32 %v2591_v37, %v3438_v4 }
 0x12d   : > { %v2604_v10 = vpop.f32.mrf.mxu0  ;;  %v1067_v23 = vrot.slane %v1066_v59, 1  ;;  %v1073_v1 = vadd.f32 %v1072_v43, %v1071_v46  ;;  %v1252_v31 = vadd.f32 %v1251_v40, %v1250_v9  ;;  %v1270_v14 = vrot.slane %v1269_v56, 4 }
 0x12e   : > { %v2594_v36 = vpop.f32.mrf.mxu1  ;;  %v1449_v52 = vrot.slane %v1448_v61, 4  ;;  %v1627_v47 = vmul.f32 %v2601_v49, %v3442_v12  ;;  %v1437_v8 = vmul.f32 %v1414_v28, %v3440_v6  ;;  %v1626_v51 = vmul.f32 %v1587_v44, %v3445_v33 }
 0x12f   : > { %v1597_v3 = vpop.f32.mrf.mxu0  ;;  %v3554_v50 = vadd.f32 %v1060_v42, %v1059_v57  ;;  %v3556_v30 = vadd.f32 %v888_v19, %v887_v60  ;;  %v1080_v0 = vadd.f32 %v1079_v39, %v1078_v63  ;;  %v1258_v41 = vrot.slane %v1257_v38, 2 }
 0x130   : > { %v1424_v35 = vpop.f32.mrf.mxu1  ;;  %v1265_v29 = vrot.slane %v1264_v21, 2  ;;  %v1443_v46 = vadd.f32 %v1442_v32, %v1441_v58  ;;  %v1455_v9 = vadd.f32 %v1438_v2, %v1437_v8  ;;  %v1634_v43 = vadd.f32 %v1627_v47, %v1626_v51 }
 0x131   : > { %v2607_v53 = vpop.f32.mrf.mxu0  ;;  %v3558_v7 = vadd.f32 %v1067_v23, %v1066_v59  ;;  %v1074_v49 = vrot.slane %v1073_v1, 1  ;;  %v1271_v15 = vadd.f32 %v1270_v14, %v1269_v56  ;;  %v1450_v25 = vadd.f32 %v1449_v52, %v1448_v61 }
 0x132   : > { %v2617_v37 = vpop.f32.mrf.mxu1  ;;  %v1253_v44 = vrot.slane %v1252_v31, 1  ;;  %v1456_v22 = vrot.slane %v1455_v9, 4  ;;  %v1635_v57 = vrot.slane %v1634_v43, 4  ;;  %v1440_v60 = vmul.f32 %v2594_v36, %v3438_v4 }
 0x133   : > { %v1607_v40 = vpop.f32.mrf.mxu0  ;;  %v1081_v63 = vrot.slane %v1080_v0, 1  ;;  %v1259_v19 = vadd.f32 %v1258_v41, %v1257_v38  ;;  %v1439_v39 = vmul.f32 %v1424_v35, %v3440_v6  ;;  %v1628_v58 = vmul.f32 %v1597_v3, %v3445_v33 }
 0x134   : > { %v1787_v28 = vpop.f32.mrf.mxu1  ;;  %v1266_v2 = vadd.f32 %v1265_v29, %v1264_v21  ;;  %v1444_v59 = vrot.slane %v1443_v46, 2  ;;  %v1457_v23 = vadd.f32 %v1456_v22, %v1455_v9  ;;  %v1629_v56 = vmul.f32 %v2604_v10, %v3442_v12 }
 0x135   : > { %v2610_v42 = vpop.f32.mrf.mxu0  ;;  %v3564_v14 = vadd.f32 %v1074_v49, %v1073_v1  ;;  %v1272_v52 = vrot.slane %v1271_v15, 2  ;;  %v1451_v47 = vrot.slane %v1450_v25, 2  ;;  %v1636_v8 = vadd.f32 %v1635_v57, %v1634_v43 }
 0x136   : > { %v2620_v32 = vpop.f32.mrf.mxu1  ;;  %v3566_v36 = vadd.f32 %v1253_v44, %v1252_v31  ;;  %v1462_v38 = vadd.f32 %v1440_v60, %v1439_v39  ;;  %v1641_v51 = vadd.f32 %v1629_v56, %v1628_v58  ;;  %v1827_v6 = vmul.f32 %v2617_v37, %v3480_v17 }
 0x137   : > { %v1617_v61 = vpop.f32.mrf.mxu0  ;;  %v1260_v35 = vrot.slane %v1259_v19, 1  ;;  %v1458_v21 = vrot.slane %v1457_v23, 2  ;;  %v1631_v41 = vmul.f32 %v2607_v53, %v3442_v12  ;;  %v1630_v10 = vmul.f32 %v1607_v40, %v3445_v33 }
 0x138   : > { %v1797_v4 = vpop.f32.mrf.mxu1  ;;  %3701 = vst [vmem:[#allocation3_spill] sm:$0xff] %v3566_v36  ;;  %v3571_v1 = vadd.f32 %v1081_v63, %v1080_v0  ;;  %v1267_v9 = vrot.slane %v1266_v2, 1  ;;  %v1445_v49 = vadd.f32 %v1444_v59, %v1443_v46  ;;  %v1826_v43 = vmul.f32 %v1787_v28, %v3486_v34 }
 0x139   : > { %v2633_v3 = vpop.f32.mrf.mxu0  ;;  %v1273_v44 = vadd.f32 %v1272_v52, %v1271_v15  ;;  %v1452_v22 = vadd.f32 %v1451_v47, %v1450_v25  ;;  %v1637_v57 = vrot.slane %v1636_v8, 2  ;;  %v1648_v60 = vadd.f32 %v1631_v41, %v1630_v10 }
 0x13a   : > { %v2623_v29 = vpop.f32.mrf.mxu1  ;;  %v1463_v37 = vrot.slane %v1462_v38, 4  ;;  %v1642_v39 = vrot.slane %v1641_v51, 4  ;;  %v1834_v58 = vadd.f32 %v1827_v6, %v1826_v43  ;;  %v1829_v56 = vmul.f32 %v2620_v32, %v3480_v17 }
 0x13b   : > { %v1980_v31 = vpop.f32.mrf.mxu0  ;;  %v1459_v40 = vadd.f32 %v1458_v21, %v1457_v23  ;;  %v1649_v36 = vrot.slane %v1648_v60, 4  ;;  %v1633_v0 = vmul.f32 %v2610_v42, %v3442_v12  ;;  %v1632_v46 = vmul.f32 %v1617_v61, %v3445_v33 }
 0x13c   : > { %v1807_v53 = vpop.f32.mrf.mxu1  ;;  %v3577_v63 = vadd.f32 %v1260_v35, %v1259_v19  ;;  %v3579_v28 = vadd.f32 %v1267_v9, %v1266_v2  ;;  %v1446_v15 = vrot.slane %v1445_v49, 1  ;;  %v1828_v25 = vmul.f32 %v1797_v4, %v3486_v34 }
 0x13d   : > { %v2636_v45 = vpop.f32.mrf.mxu0  ;;  %v1274_v52 = vrot.slane %v1273_v44, 1  ;;  %v1453_v47 = vrot.slane %v1452_v22, 1  ;;  %v1835_v6 = vrot.slane %v1834_v58, 4  ;;  %v1655_v32 = vadd.f32 %v1633_v0, %v1632_v46 }
 0x13e   : > { %3702 = vst [vmem:[#allocation4_spill] sm:$0xff] %v3579_v28  ;;  %v3582_v41 = vadd.f32 %v1637_v57, %v1636_v8  ;;  %v1464_v23 = vadd.f32 %v1463_v37, %v1462_v38  ;;  %v1841_v21 = vadd.f32 %v1829_v56, %v1828_v25  ;;  %v1831_v12 = vmul.f32 %v2623_v29, %v3480_v17  ;;  %v2626_v42 = vpop.f32.mrf.mxu1 }
 0x13f   : > { %v1990_v59 = vpop.f32.mrf.mxu0  ;;  %v1460_v19 = vrot.slane %v1459_v40, 1  ;;  %v1643_v61 = vadd.f32 %v1642_v39, %v1641_v51  ;;  %v1650_v2 = vadd.f32 %v1649_v36, %v1648_v60  ;;  %v1656_v35 = vrot.slane %v1655_v32, 4 }
 0x140   : > { %v1842_v10 = vrot.slane %v1841_v21, 4  ;;  %v2020_v4 = vmul.f32 %v2633_v3, %v3500_v26  ;;  %v1830_v9 = vmul.f32 %v1807_v53, %v3486_v34  ;;  %v2019_v43 = vmul.f32 %v1980_v31, %v3502_v5  ;;  %v1817_v60 = vpop.f32.mrf.mxu1 }
 0x141   : > { %v2639_v33 = vpop.f32.mrf.mxu0  ;;  %v3588_v8 = vadd.f32 %v1446_v15, %v1445_v49  ;;  %v3590_v38 = vadd.f32 %v1274_v52, %v1273_v44  ;;  %v3592_v57 = vadd.f32 %v1453_v47, %v1452_v22  ;;  %v1836_v29 = vadd.f32 %v1835_v6, %v1834_v58 }
 0x142   : > { %v1657_v37 = vadd.f32 %v1656_v35, %v1655_v32  ;;  %v1843_v56 = vadd.f32 %v1842_v10, %v1841_v21  ;;  %v1848_v51 = vadd.f32 %v1831_v12, %v1830_v9  ;;  %v2027_v36 = vadd.f32 %v2020_v4, %v2019_v43 }
 0x143   : > { %v2000_v0 = vpop.f32.mrf.mxu0  ;;  %3703 = vst [vmem:[#allocation5_spill] sm:$0xff] %v3590_v38  ;;  %v1639_v39 = vrot.slane %v3582_v41, 1  ;;  %v1465_v3 = vrot.slane %v1464_v23, 2  ;;  %v1644_v46 = vrot.slane %v1643_v61, 2  ;;  %v1833_v53 = vmul.f32 %v2626_v42, %v3480_v17 }
 0x144   : > { %v3596_v31 = vadd.f32 %v1460_v19, %v1459_v40  ;;  %v1651_v49 = vrot.slane %v1650_v2, 2  ;;  %v1849_v15 = vrot.slane %v1848_v51, 4  ;;  %v2028_v44 = vrot.slane %v2027_v36, 4 }
 0x145   : > { %v2642_v25 = vpop.f32.mrf.mxu0  ;;  %v1837_v22 = vrot.slane %v1836_v29, 2  ;;  %v2022_v58 = vmul.f32 %v2636_v45, %v3500_v26  ;;  %v1832_v52 = vmul.f32 %v1817_v60, %v3486_v34  ;;  %v2021_v47 = vmul.f32 %v1990_v59, %v3502_v5 }
 0x146   : > { %v1658_v6 = vrot.slane %v1657_v37, 2  ;;  %v1844_v32 = vrot.slane %v1843_v56, 2  ;;  %v1850_v21 = vadd.f32 %v1849_v15, %v1848_v51  ;;  %v2029_v12 = vadd.f32 %v2028_v44, %v2027_v36 }
 0x147   : > { %v1466_v35 = vadd.f32 %v1465_v3, %v1464_v23  ;;  %v1645_v10 = vadd.f32 %v1644_v46, %v1643_v61  ;;  %v1855_v17 = vadd.f32 %v1833_v53, %v1832_v52  ;;  %v2034_v40 = vadd.f32 %v2022_v58, %v2021_v47  ;;  %v2010_v43 = vpop.f32.mrf.mxu0 }
 0x148   : > { %v1851_v42 = vrot.slane %v1850_v21, 2  ;;  %v2030_v19 = vrot.slane %v2029_v12, 2  ;;  %v2024_v4 = vmul.f32 %v2639_v33, %v3500_v26  ;;  %v2023_v9 = vmul.f32 %v2000_v0, %v3502_v5 }
 0x149   : > { %v1652_v45 = vadd.f32 %v1651_v49, %v1650_v2  ;;  %v1838_v38 = vadd.f32 %v1837_v22, %v1836_v29  ;;  %v1856_v34 = vrot.slane %v1855_v17, 4  ;;  %v2035_v60 = vrot.slane %v2034_v40, 4 }
 0x14a   : > { %v1659_v59 = vadd.f32 %v1658_v6, %v1657_v37  ;;  %v1845_v28 = vadd.f32 %v1844_v32, %v1843_v56  ;;  %v2041_v51 = vadd.f32 %v2024_v4, %v2023_v9  ;;  %v2026_v23 = vmul.f32 %v2642_v25, %v3500_v26 }
 0x14b   : > { %v1852_v61 = vadd.f32 %v1851_v42, %v1850_v21  ;;  %v1857_v36 = vadd.f32 %v1856_v34, %v1855_v17  ;;  %v2036_v3 = vadd.f32 %v2035_v60, %v2034_v40  ;;  %v2025_v46 = vmul.f32 %v2010_v43, %v3502_v5 }
 0x14c   : > { %v1467_v33 = vrot.slane %v1466_v35, 1  ;;  %v1646_v0 = vrot.slane %v1645_v10, 1  ;;  %v2031_v53 = vadd.f32 %v2030_v19, %v2029_v12  ;;  %v2042_v2 = vrot.slane %v2041_v51, 4 }
 0x14d   : > { %v1653_v29 = vrot.slane %v1652_v45, 1  ;;  %v1858_v49 = vrot.slane %v1857_v36, 2  ;;  %v2037_v37 = vrot.slane %v2036_v3, 2  ;;  %v2048_v56 = vadd.f32 %v2026_v23, %v2025_v46 }
 0x14e   : > { %v1839_v15 = vrot.slane %v1838_v38, 1  ;;  %v1660_v26 = vrot.slane %v1659_v59, 1  ;;  %v1846_v44 = vrot.slane %v1845_v28, 1  ;;  %v2043_v25 = vadd.f32 %v2042_v2, %v2041_v51 }
 0x14f   : > { %v1853_v22 = vrot.slane %v1852_v61, 1  ;;  %v1859_v5 = vadd.f32 %v1858_v49, %v1857_v36  ;;  %v2038_v58 = vadd.f32 %v2037_v37, %v2036_v3  ;;  %v2049_v52 = vrot.slane %v2048_v56, 4 }
 0x150   : > { %v1640_v47 = vadd.f32 %v1639_v39, %v3582_v41  ;;  %v1468_v6 = vadd.f32 %v1467_v33, %v1466_v35  ;;  %v2032_v32 = vrot.slane %v2031_v53, 1  ;;  %v2044_v21 = vrot.slane %v2043_v25, 2 }
 0x151   : > { %v1647_v12 = vadd.f32 %v1646_v0, %v1645_v10  ;;  %v1654_v17 = vadd.f32 %v1653_v29, %v1652_v45  ;;  %v2039_v40 = vrot.slane %v2038_v58, 1  ;;  %v2050_v42 = vadd.f32 %v2049_v52, %v2048_v56  ;;  %v3704_v29 = vld [vmem:[#allocation3_spill] sm:$0xff]  ;;  %v3706_v56 = vld [vmem:[#allocation4_spill] sm:$0xff] }
 0x152   : > { %v1840_v19 = vadd.f32 %v1839_v15, %v1838_v38  ;;  %v1860_v4 = vrot.slane %v1859_v5, 1  ;;  %v2045_v9 = vadd.f32 %v2044_v21, %v2043_v25  ;;  %v2081_v43 = vsel %vm2059_vm11, %v3545_v11, %v3534_v55  ;;  %v3707_v15 = vld [vmem:[#allocation5_spill] sm:$0xff] }
 0x153   : > { %v1661_v34 = vadd.f32 %v1660_v26, %v1659_v59  ;;  %v1847_v60 = vadd.f32 %v1846_v44, %v1845_v28  ;;  %v1854_v51 = vadd.f32 %v1853_v22, %v1852_v61  ;;  %v2051_v23 = vrot.slane %v2050_v42, 2  ;;  %v2137_v44 = vld [vmem:[%s3697_s2] sm:$0xff] }
 0x154   : > { %v2033_v36 = vadd.f32 %v2032_v32, %v2031_v53  ;;  %v2046_v41 = vrot.slane %v2045_v9, 1  ;;  %v2082_v39 = vsel %vm2061_vm12, %v3547_v18, %v2081_v43  ;;  %v2089_v35 = vsel %vm2070_vm13, %v3558_v7, %v3554_v50 }
 0x155   : > { %v2040_v38 = vadd.f32 %v2039_v40, %v2038_v58  ;;  %v2052_v10 = vadd.f32 %v2051_v23, %v2050_v42  ;;  %v2083_v45 = vsel %vm2063_vm14, %v3556_v30, %v2082_v39  ;;  %v2090_v55 = vsel %vm2072_vm15, %v3564_v14, %v2089_v35 }
 0x156   : > { %v1861_v11 = vadd.f32 %v1860_v4, %v1859_v5  ;;  %v2047_v28 = vadd.f32 %v2046_v41, %v2045_v9  ;;  %v2091_v59 = vsel %vm2074_vm1, %v3571_v1, %v2090_v55  ;;  %v2060_v18 = vsel %vm2059_vm11, %v3520_v13, %v3507_v16 }
 0x157   : > { %v2053_v61 = vrot.slane %v2052_v10, 1  ;;  %v2134_v50 = vsel %vm2132_vm2, %v2083_v45, %v2091_v59  ;;  %v2062_v7 = vsel %vm2061_vm12, %v3524_v24, %v2060_v18  ;;  %v2071_v30 = vsel %vm2070_vm13, %v3527_v27, %v3522_v62 }
 0x158   : > { %v2113_v14 = vsel %vm2059_vm11, %v1647_v12, %v1640_v47  ;;  %v2121_v3 = vsel %vm2070_vm13, %v1847_v60, %v1840_v19  ;;  %v2064_v1 = vsel %vm2063_vm14, %v3513_v20, %v2062_v7  ;;  %v2073_v16 = vsel %vm2072_vm15, %v3532_v48, %v2071_v30 }
 0x159   : > { %v2054_v13 = vadd.f32 %v2053_v61, %v2052_v10  ;;  %v2129_v46 = vsel %vm2059_vm11, %v2040_v38, %v2033_v36  ;;  %v2122_v33 = vsel %vm2072_vm15, %v1854_v51, %v2121_v3  ;;  %v2075_v24 = vsel %vm2074_vm1, %v3539_v54, %v2073_v16 }
 0x15a   : > { %v2130_v62 = vsel %vm2061_vm12, %v2047_v28, %v2129_v46  ;;  %v2123_v27 = vsel %vm2074_vm1, %v1861_v11, %v2122_v33  ;;  %v2105_v0 = vsel %vm2070_vm13, %v3592_v57, %v3588_v8  ;;  %v2133_v20 = vsel %vm2132_vm2, %v2064_v1, %v2075_v24 }
 0x15b   : > { %v2131_v48 = vsel %vm2063_vm14, %v2054_v13, %v2130_v62  ;;  %v2114_v53 = vsel %vm2061_vm12, %v1654_v17, %v2113_v14  ;;  %v2106_v2 = vsel %vm2072_vm15, %v3596_v31, %v2105_v0  ;;  %v2097_v49 = vsel %vm2059_vm11, %v3577_v63, %v3704_v29 }
 0x15c   : > { %2644 = vmatpush3.msk.msra.mxu1 %vm2132_vm2, %v2131_v48  ;;  %v2115_v54 = vsel %vm2063_vm14, %v1661_v34, %v2114_v53  ;;  %v2107_v37 = vsel %vm2074_vm1, %v1468_v6, %v2106_v2  ;;  %v3705_v8 = vmov 0.0   ;;  %v2098_v31 = vsel %vm2061_vm12, %v3706_v56, %v2097_v49 }
 0x15d   : > { %2645 = vmatprep.subr.mxu1 %v3705_v8  ;;  %v2136_v57 = vsel %vm2132_vm2, %v2115_v54, %v2123_v27  ;;  %v2099_v26 = vsel %vm2063_vm14, %v3707_v15, %v2098_v31 }
 0x15e   : > { %2646 = vmatpush3.msra.mxu1 %v2136_v57  ;;  %v2135_v63 = vsel %vm2132_vm2, %v2099_v26, %v2107_v37 }
 0x15f   : > { %2647 = vmatprep.subr.mxu1 %v3705_v8 }
 0x160   : > { %2648 = vmatpush3.msra.mxu1 %v2135_v63 }
 0x161   : > { %2649 = vmatprep.subr.mxu1 %v3705_v8 }
 0x162   : > { %2650 = vmatpush3.msra.mxu1 %v2134_v50 }
 0x163   : > { %2651 = vmatprep.subr.mxu1 %v3705_v8 }
 0x164   : > { %2652 = vmatpush3.msra.mxu1 %v2133_v20 }
 0x165   : > { %2654 = vmatmul.mubr.msk.f32.vlgmr.msra.gmra.mxu1 %vm2138_vm3, %v2137_v44 }
 0x225   : > { %v2210_v25 = vpop.f32.mrf.mxu1 }
 0x226   : > { %v2214_v22 = vmax.f32 %v2210_v25, 0.0 }
 0x227   : > { %v2655_v5 = vpop.f32.mrf.mxu1 }
 0x228   : > { %2215 = vst [vmem:[%s257_s4] sm:$0xff] %v2214_v22 }
 0x229 PF: > { %s13_s18 = sadd.s32 1, %s2781_s18   ;;  %s3708_s12 = smov %s2761_s13 }
 0x22a   : > { %p10_p12 = scmp.ge.s32.totalorder %s13_s18, 6   ;;  %s3709_s13 = smov %s2856_s25 }
 0x22b   : > { %s3710_s14 = smov %s2773_s16  ;;  %s3711_s15 = smov %s2777_s17 }
 0x22c   : > { %s3712_s16 = smov %s3715_s19  ;;  %s3713_s17 = smov %s3719_s20 }
 0x22d   :  { %12 = sbr.rel (!%p10_p12) target bundleno = 4 (0x4), region = 108 }

</bundles_post_ra>
